<compile_context>
chip_gen: v7x
topology: tpu7x:2x2x1
jax: 0.10.0
libtpu: 0.0.40
codegen_flags: <defaults>
</compile_context>

<pallas_src>
import math
from functools import partial

import numpy as np
import jax
import jax.numpy as jnp
from jax.experimental import pallas as pl
from jax.experimental.pallas import tpu as pltpu

EPS = 1e-6                 # LayerNorm eps (added to std, matching PyTorch)
NEG_INF = -1e9             # masked_fill value
_COMPUTE = jnp.bfloat16    # MXU operand dtype (accumulation stays f32)

_CPARAMS = pltpu.CompilerParams(
    dimension_semantics=("parallel",),
    vmem_limit_bytes=32 * 1024 * 1024,
)


# ----------------------------------------------------------------------------
# In-kernel helpers
# ----------------------------------------------------------------------------
def _layernorm(x, a, b):
    """PyTorch-style LayerNorm: a*(x-mean)/(std+eps)+b with unbiased std.

    x: (R, D) float32, a/b: (1, D) float32.
    """
    d = x.shape[-1]
    mean = jnp.mean(x, axis=-1, keepdims=True)
    diff = x - mean
    var = jnp.sum(diff * diff, axis=-1, keepdims=True) * (1.0 / (d - 1))
    inv = pl.reciprocal(jnp.sqrt(var) + EPS, approx=True)      # EUP
    return a * (diff * inv) + b


def _mha_heads(q, k, v, mask, h, dk):
    """Per-head scaled-dot-product attention, heads folded into lanes.

    q: (T, D) f32 (already scaled by 1/sqrt(dk)), k/v: (S, D) f32,
    mask: (Tm, S) int32 with Tm in {1, T}.  Returns (T, D) f32.
    """
    outs = []
    for hh in range(h):                       # static unroll, h is small
        sl = slice(hh * dk, (hh + 1) * dk)
        qh = q[:, sl].astype(_COMPUTE)
        kh = k[:, sl].astype(_COMPUTE)
        vh = v[:, sl].astype(_COMPUTE)
        s = jax.lax.dot_general(qh, kh, (((1,), (1,)), ((), ())),
                                preferred_element_type=jnp.float32)   # (T, S)
        s = jnp.where(mask == 0, NEG_INF, s)
        s = s - jnp.max(s, axis=-1, keepdims=True)
        p = jnp.exp(s)
        p = p * pl.reciprocal(jnp.sum(p, axis=-1, keepdims=True), approx=True)
        outs.append(jnp.dot(p.astype(_COMPUTE), vh,
                            preferred_element_type=jnp.float32))
    return jnp.concatenate(outs, axis=-1)     # (T, D), lane-dense


# ----------------------------------------------------------------------------
# Fused sublayer kernels
# ----------------------------------------------------------------------------
def make_self_attn_kernel(h, dk):
    scale = 1.0 / math.sqrt(dk)

    def kernel(x_ref, mask_ref, a_ref, b_ref, wqkv_ref, bqkv_ref,
               wo_ref, bo_ref, o_ref):
        x = x_ref[0].astype(jnp.float32)                 # (T, D)
        d = x.shape[-1]
        nx = _layernorm(x, a_ref[...], b_ref[...])
        qkv = jnp.dot(nx.astype(_COMPUTE), wqkv_ref[...],
                      preferred_element_type=jnp.float32) + bqkv_ref[...]
        q = qkv[:, :d] * scale
        k = qkv[:, d:2 * d]
        v = qkv[:, 2 * d:]
        attn = _mha_heads(q, k, v, mask_ref[0], h, dk)   # (T, D)
        y = jnp.dot(attn.astype(_COMPUTE), wo_ref[...],
                    preferred_element_type=jnp.float32) + bo_ref[...]
        o_ref[0] = (x + y).astype(o_ref.dtype)           # fused residual

    return kernel


def make_cross_attn_kernel(h, dk):
    scale = 1.0 / math.sqrt(dk)

    def kernel(x_ref, mem_ref, mask_ref, a_ref, b_ref, wq_ref, bq_ref,
               wkv_ref, bkv_ref, wo_ref, bo_ref, o_ref):
        x = x_ref[0].astype(jnp.float32)                 # (T, D)
        d = x.shape[-1]
        nx = _layernorm(x, a_ref[...], b_ref[...])
        mem = mem_ref[0].astype(_COMPUTE)                # (S, D)
        q = (jnp.dot(nx.astype(_COMPUTE), wq_ref[...],
                     preferred_element_type=jnp.float32) + bq_ref[...]) * scale
        kv = jnp.dot(mem, wkv_ref[...],
                     preferred_element_type=jnp.float32) + bkv_ref[...]
        k = kv[:, :d]
        v = kv[:, d:]
        attn = _mha_heads(q, k, v, mask_ref[0], h, dk)
        y = jnp.dot(attn.astype(_COMPUTE), wo_ref[...],
                    preferred_element_type=jnp.float32) + bo_ref[...]
        o_ref[0] = (x + y).astype(o_ref.dtype)           # fused residual

    return kernel


def ffn_kernel(x_ref, a_ref, b_ref, w1_ref, b1_ref, w2_ref, b2_ref, o_ref):
    x = x_ref[...].astype(jnp.float32)                   # (rows, D)
    nx = _layernorm(x, a_ref[...], b_ref[...])
    h1 = jnp.dot(nx.astype(_COMPUTE), w1_ref[...],
                 preferred_element_type=jnp.float32) + b1_ref[...]
    h1 = jnp.maximum(h1, 0.0)
    y = jnp.dot(h1.astype(_COMPUTE), w2_ref[...],
                preferred_element_type=jnp.float32) + b2_ref[...]
    o_ref[...] = (x + y).astype(o_ref.dtype)             # fused residual


# ----------------------------------------------------------------------------
# Pallas wrappers
# ----------------------------------------------------------------------------
def _wspec(i):
    return (0, 0)


def self_attn_sublayer(x, mask, ln_p, p, h):
    B, T, D = x.shape
    dk = D // h
    Tm, S = mask.shape[1], mask.shape[2]
    wqkv = jnp.concatenate([p['wq'], p['wk'], p['wv']], axis=1).astype(_COMPUTE)
    bqkv = jnp.concatenate([p['bq'], p['bk'], p['bv']])[None, :]
    wo = p['wo'].astype(_COMPUTE)
    bo = p['bo'][None, :]
    a = ln_p['a'][None, :]
    b = ln_p['b'][None, :]
    mask_i = mask.astype(jnp.int32)

    return pl.pallas_call(
        make_self_attn_kernel(h, dk),
        out_shape=jax.ShapeDtypeStruct((B, T, D), x.dtype),
        grid=(B,),
        in_specs=[
            pl.BlockSpec((1, T, D), lambda i: (i, 0, 0)),
            pl.BlockSpec((1, Tm, S), lambda i: (i, 0, 0)),
            pl.BlockSpec((1, D), _wspec),
            pl.BlockSpec((1, D), _wspec),
            pl.BlockSpec((D, 3 * D), _wspec),
            pl.BlockSpec((1, 3 * D), _wspec),
            pl.BlockSpec((D, D), _wspec),
            pl.BlockSpec((1, D), _wspec),
        ],
        out_specs=pl.BlockSpec((1, T, D), lambda i: (i, 0, 0)),
        compiler_params=_CPARAMS,
    )(x, mask_i, a, b, wqkv, bqkv, wo, bo)


def cross_attn_sublayer(x, memory, mask, ln_p, p, h):
    B, T, D = x.shape
    S = memory.shape[1]
    dk = D // h
    Tm = mask.shape[1]
    wq = p['wq'].astype(_COMPUTE)
    bq = p['bq'][None, :]
    wkv = jnp.concatenate([p['wk'], p['wv']], axis=1).astype(_COMPUTE)
    bkv = jnp.concatenate([p['bk'], p['bv']])[None, :]
    wo = p['wo'].astype(_COMPUTE)
    bo = p['bo'][None, :]
    a = ln_p['a'][None, :]
    b = ln_p['b'][None, :]
    mask_i = mask.astype(jnp.int32)

    return pl.pallas_call(
        make_cross_attn_kernel(h, dk),
        out_shape=jax.ShapeDtypeStruct((B, T, D), x.dtype),
        grid=(B,),
        in_specs=[
            pl.BlockSpec((1, T, D), lambda i: (i, 0, 0)),
            pl.BlockSpec((1, S, D), lambda i: (i, 0, 0)),
            pl.BlockSpec((1, Tm, S), lambda i: (i, 0, 0)),
            pl.BlockSpec((1, D), _wspec),
            pl.BlockSpec((1, D), _wspec),
            pl.BlockSpec((D, D), _wspec),
            pl.BlockSpec((1, D), _wspec),
            pl.BlockSpec((D, 2 * D), _wspec),
            pl.BlockSpec((1, 2 * D), _wspec),
            pl.BlockSpec((D, D), _wspec),
            pl.BlockSpec((1, D), _wspec),
        ],
        out_specs=pl.BlockSpec((1, T, D), lambda i: (i, 0, 0)),
        compiler_params=_CPARAMS,
    )(x, memory, mask_i, a, b, wq, bq, wkv, bkv, wo, bo)


def _pick_row_block(rows, max_block=512):
    """Largest convenient row block; prefer >= 2 grid steps for megacore."""
    half = rows // 2
    if rows % 2 == 0 and half % 8 == 0 and half <= max_block:
        return half
    for blk in (512, 256, 128, 64, 32, 16, 8):
        if blk <= max_block and blk <= rows and rows % blk == 0:
            return blk
    return rows


def ffn_sublayer(x, ln_p, w1, b1, w2, b2):
    B, T, D = x.shape
    rows = B * T
    d_ff = w1.shape[1]
    x2 = x.reshape(rows, D)                 # contiguous reshape: no data move
    blk = _pick_row_block(rows)
    a = ln_p['a'][None, :]
    b = ln_p['b'][None, :]

    out = pl.pallas_call(
        ffn_kernel,
        out_shape=jax.ShapeDtypeStruct((rows, D), x.dtype),
        grid=(rows // blk,),
        in_specs=[
            pl.BlockSpec((blk, D), lambda i: (i, 0)),
            pl.BlockSpec((1, D), _wspec),
            pl.BlockSpec((1, D), _wspec),
            pl.BlockSpec((D, d_ff), _wspec),
            pl.BlockSpec((1, d_ff), _wspec),
            pl.BlockSpec((d_ff, D), _wspec),
            pl.BlockSpec((1, D), _wspec),
        ],
        out_specs=pl.BlockSpec((blk, D), lambda i: (i, 0)),
        compiler_params=_CPARAMS,
    )(x2, a, b, w1.astype(_COMPUTE), b1[None, :], w2.astype(_COMPUTE), b2[None, :])
    return out.reshape(B, T, D)


def decoder_layer(params, x, memory, src_mask, tgt_mask, h):
    # sublayer[0]: x + self_attn(norm(x), norm(x), norm(x), tgt_mask)
    x = self_attn_sublayer(x, tgt_mask, params['ln0'], params['self_attn'], h)
    # sublayer[1]: x + src_attn(norm(x), memory, memory, src_mask)
    x = cross_attn_sublayer(x, memory, src_mask, params['ln1'],
                            params['src_attn'], h)
    # sublayer[2]: x + w2(relu(w1(norm(x))))
    x = ffn_sublayer(x, params['ln2'], params['ff_w1'], params['ff_b1'],
                     params['ff_w2'], params['ff_b2'])
    return x


# ----------------------------------------------------------------------------
# Pure-JAX reference (same math; mirrors the bf16 MXU-operand / f32-accumulate
# precision policy so the comparison is apples-to-apples)
# ----------------------------------------------------------------------------
def reference(params, x, memory, src_mask, tgt_mask, h):
    c = _COMPUTE

    def dot(z, w):
        return jnp.dot(z.astype(c), w.astype(c),
                       preferred_element_type=jnp.float32)

    def ln(z, p):
        mean = jnp.mean(z, axis=-1, keepdims=True)
        diff = z - mean
        var = jnp.sum(diff * diff, axis=-1, keepdims=True) / (z.shape[-1] - 1)
        return p['a'] * diff / (jnp.sqrt(var) + EPS) + p['b']

    def mha(p, q, k, v, mask):
        B, Tq, D = q.shape
        dk = D // h

        def split(z, w, b):
            return (dot(z, w) + b).reshape(z.shape[0], -1, h, dk).transpose(0, 2, 1, 3)

        Q = split(q, p['wq'], p['bq'])
        K = split(k, p['wk'], p['bk'])
        V = split(v, p['wv'], p['bv'])
        s = jnp.einsum('bhqd,bhkd->bhqk', Q.astype(c), K.astype(c),
                       preferred_element_type=jnp.float32) / math.sqrt(dk)
        s = jnp.where(mask[:, None, :, :] == 0, NEG_INF, s)
        pa = jax.nn.softmax(s, axis=-1)
        out = jnp.einsum('bhqk,bhkd->bhqd', pa.astype(c), V.astype(c),
                         preferred_element_type=jnp.float32)
        out = out.transpose(0, 2, 1, 3).reshape(B, Tq, D)
        return dot(out, p['wo']) + p['bo']

    nx = ln(x, params['ln0'])
    x = x + mha(params['self_attn'], nx, nx, nx, tgt_mask)
    nx = ln(x, params['ln1'])
    x = x + mha(params['src_attn'], nx, memory, memory, src_mask)
    nx = ln(x, params['ln2'])
    ff = dot(jnp.maximum(dot(nx, params['ff_w1']) + params['ff_b1'], 0.0),
             params['ff_w2']) + params['ff_b2']
    return x + ff


# ----------------------------------------------------------------------------
# Deterministic parameter init & driver
# ----------------------------------------------------------------------------
def init_linear(key, din, dout):
    kw, kb = jax.random.split(key)
    w = jax.random.normal(kw, (din, dout), jnp.float32) / np.sqrt(din)
    b = jax.random.normal(kb, (dout,), jnp.float32) * 0.01
    return w, b


def init_attn(key, d_model):
    ks = jax.random.split(key, 4)
    wq, bq = init_linear(ks[0], d_model, d_model)
    wk, bk = init_linear(ks[1], d_model, d_model)
    wv, bv = init_linear(ks[2], d_model, d_model)
    wo, bo = init_linear(ks[3], d_model, d_model)
    return dict(wq=wq, bq=bq, wk=wk, bk=bk, wv=wv, bv=bv, wo=wo, bo=bo)


if __name__ == "__main__":
    B, T, S = 2, 8, 10          # batch, tgt seq len, src (memory) seq len
    D, H, D_FF = 32, 4, 64      # d_model, heads, feed-forward hidden

    root = jax.random.PRNGKey(0)
    k_in, k_mem, k_sa, k_ca, k_f1, k_f2 = jax.random.split(root, 6)

    # LayerNorm params as in the module's __init__: a_2 = ones, b_2 = zeros.
    ln_p = lambda: dict(a=jnp.ones((D,), jnp.float32), b=jnp.zeros((D,), jnp.float32))
    ff_w1, ff_b1 = init_linear(k_f1, D, D_FF)
    ff_w2, ff_b2 = init_linear(k_f2, D_FF, D)
    params = dict(
        ln0=ln_p(), ln1=ln_p(), ln2=ln_p(),
        self_attn=init_attn(k_sa, D),
        src_attn=init_attn(k_ca, D),
        ff_w1=ff_w1, ff_b1=ff_b1, ff_w2=ff_w2, ff_b2=ff_b2,
    )

    x = jax.random.normal(k_in, (B, T, D), jnp.float32)
    memory = jax.random.normal(k_mem, (B, S, D), jnp.float32)

    # tgt_mask: causal (B, T, T); src_mask: (B, 1, S) with some padding masked.
    tgt_mask = jnp.broadcast_to(jnp.tril(jnp.ones((T, T), jnp.float32)), (B, T, T))
    src_valid = jnp.arange(S)[None, :] < jnp.array([[S], [S - 3]])
    src_mask = src_valid.astype(jnp.float32)[:, None, :]   # (B, 1, S)

    decoder_fn = jax.jit(partial(decoder_layer, h=H))
    out = decoder_fn(params, x, memory, src_mask, tgt_mask)
    out = jax.block_until_ready(out)

    ref = reference(params, x, memory, src_mask, tgt_mask, H)
    assert out.shape == (B, T, D)
    np.testing.assert_allclose(np.asarray(out), np.asarray(ref),
                               rtol=2e-2, atol=2e-2)

    print("KERNEL_OK")
</pallas_src>

<mosaic_0001>
module attributes {stable_mosaic.version = 11 : i64} {
  func.func @kernel(%arg0: i32, %arg1: memref<1x8x32xf32, #tpu.memory_space<vmem>>, %arg2: memref<1x8x8xi32, #tpu.memory_space<vmem>>, %arg3: memref<1x32xf32, #tpu.memory_space<vmem>>, %arg4: memref<1x32xf32, #tpu.memory_space<vmem>>, %arg5: memref<32x96xbf16, #tpu.memory_space<vmem>>, %arg6: memref<1x96xf32, #tpu.memory_space<vmem>>, %arg7: memref<32x32xbf16, #tpu.memory_space<vmem>>, %arg8: memref<1x32xf32, #tpu.memory_space<vmem>>, %arg9: memref<1x8x32xf32, #tpu.memory_space<vmem>>) attributes {dimension_semantics = [#tpu.dimension_semantics<parallel>], iteration_bounds = array<i64: 2>, scalar_prefetch = 0 : i64, scratch_operands = 0 : i64, tpu.core_type = #tpu.core_type<tc>, window_params = [{transform_indices = @transform_0, window_bounds = array<i64: 1, 8, 32>}, {transform_indices = @transform_1, window_bounds = array<i64: 1, 8, 8>}, {pipeline_mode = #tpu.pipeline_mode<synchronous>, transform_indices = @transform_2, window_bounds = array<i64: 1, 32>}, {pipeline_mode = #tpu.pipeline_mode<synchronous>, transform_indices = @transform_3, window_bounds = array<i64: 1, 32>}, {pipeline_mode = #tpu.pipeline_mode<synchronous>, transform_indices = @transform_4, window_bounds = array<i64: 32, 96>}, {pipeline_mode = #tpu.pipeline_mode<synchronous>, transform_indices = @transform_5, window_bounds = array<i64: 1, 96>}, {pipeline_mode = #tpu.pipeline_mode<synchronous>, transform_indices = @transform_6, window_bounds = array<i64: 32, 32>}, {pipeline_mode = #tpu.pipeline_mode<synchronous>, transform_indices = @transform_7, window_bounds = array<i64: 1, 32>}, {transform_indices = @transform_8, window_bounds = array<i64: 1, 8, 32>}]} {
    %c0 = arith.constant 0 : index
    %c0_0 = arith.constant 0 : index
    %c0_1 = arith.constant 0 : index
    %0 = vector.load %arg1[%c0, %c0_0, %c0_1] : memref<1x8x32xf32, #tpu.memory_space<vmem>>, vector<1x8x32xf32>
    %1 = vector.shape_cast %0 : vector<1x8x32xf32> to vector<8x32xf32>
    %c0_2 = arith.constant 0 : index
    %c0_3 = arith.constant 0 : index
    %2 = vector.load %arg3[%c0_2, %c0_3] : memref<1x32xf32, #tpu.memory_space<vmem>>, vector<1x32xf32>
    %c0_4 = arith.constant 0 : index
    %c0_5 = arith.constant 0 : index
    %3 = vector.load %arg4[%c0_4, %c0_5] : memref<1x32xf32, #tpu.memory_space<vmem>>, vector<1x32xf32>
    %cst = arith.constant dense<0.000000e+00> : vector<8xf32>
    %4 = vector.multi_reduction <add>, %1, %cst [1] : vector<8x32xf32> to vector<8xf32>
    %5 = vector.shape_cast %4 : vector<8xf32> to vector<8x1xf32>
    %cst_6 = arith.constant 3.200000e+01 : f32
    %6 = vector.broadcast %cst_6 : f32 to vector<8x1xf32>
    %7 = arith.divf %5, %6 : vector<8x1xf32>
    %8 = vector.broadcast %7 : vector<8x1xf32> to vector<8x32xf32>
    %9 = arith.subf %1, %8 : vector<8x32xf32>
    %10 = arith.mulf %9, %9 : vector<8x32xf32>
    %cst_7 = arith.constant dense<0.000000e+00> : vector<8xf32>
    %11 = vector.multi_reduction <add>, %10, %cst_7 [1] : vector<8x32xf32> to vector<8xf32>
    %12 = vector.shape_cast %11 : vector<8xf32> to vector<8x1xf32>
    %cst_8 = arith.constant 0.0322580636 : f32
    %13 = vector.broadcast %cst_8 : f32 to vector<8x1xf32>
    %14 = arith.mulf %12, %13 : vector<8x1xf32>
    %15 = math.sqrt %14 : vector<8x1xf32>
    %cst_9 = arith.constant 9.99999997E-7 : f32
    %16 = vector.broadcast %cst_9 : f32 to vector<8x1xf32>
    %17 = arith.addf %15, %16 : vector<8x1xf32>
    %18 = tpu.reciprocal %17 {approx = true} : vector<8x1xf32> -> vector<8x1xf32>
    %19 = vector.broadcast %18 : vector<8x1xf32> to vector<8x32xf32>
    %20 = arith.mulf %9, %19 : vector<8x32xf32>
    %21 = vector.broadcast %2 : vector<1x32xf32> to vector<8x32xf32>
    %22 = arith.mulf %21, %20 : vector<8x32xf32>
    %23 = vector.broadcast %3 : vector<1x32xf32> to vector<8x32xf32>
    %24 = arith.addf %22, %23 : vector<8x32xf32>
    %25 = arith.truncf %24 : vector<8x32xf32> to vector<8x32xbf16>
    %c0_10 = arith.constant 0 : index
    %c0_11 = arith.constant 0 : index
    %26 = vector.load %arg5[%c0_10, %c0_11] : memref<32x96xbf16, #tpu.memory_space<vmem>>, vector<32x96xbf16>
    %cst_12 = arith.constant dense<0.000000e+00> : vector<8x96xf32>
    %27 = tpu.matmul %25, %26, %cst_12 {dimension_numbers = #tpu.dot_dimension_numbers<[1], [0], [0], [1], [0, 0, 1, 1], [], []>} : vector<8x32xbf16>, vector<32x96xbf16>, vector<8x96xf32> -> vector<8x96xf32>
    %c0_13 = arith.constant 0 : index
    %c0_14 = arith.constant 0 : index
    %28 = vector.load %arg6[%c0_13, %c0_14] : memref<1x96xf32, #tpu.memory_space<vmem>>, vector<1x96xf32>
    %29 = vector.broadcast %28 : vector<1x96xf32> to vector<8x96xf32>
    %30 = arith.addf %27, %29 : vector<8x96xf32>
    %31 = vector.extract_strided_slice %30 {offsets = [0, 0], sizes = [8, 32], strides = [1, 1]} : vector<8x96xf32> to vector<8x32xf32>
    %cst_15 = arith.constant 0.353553385 : f32
    %32 = vector.broadcast %cst_15 : f32 to vector<8x32xf32>
    %33 = arith.mulf %31, %32 : vector<8x32xf32>
    %34 = vector.extract_strided_slice %30 {offsets = [0, 32], sizes = [8, 32], strides = [1, 1]} : vector<8x96xf32> to vector<8x32xf32>
    %35 = vector.extract_strided_slice %30 {offsets = [0, 64], sizes = [8, 32], strides = [1, 1]} : vector<8x96xf32> to vector<8x32xf32>
    %c0_16 = arith.constant 0 : index
    %c0_17 = arith.constant 0 : index
    %c0_18 = arith.constant 0 : index
    %36 = vector.load %arg2[%c0_16, %c0_17, %c0_18] : memref<1x8x8xi32, #tpu.memory_space<vmem>>, vector<1x8x8xi32>
    %37 = vector.shape_cast %36 : vector<1x8x8xi32> to vector<8x8xi32>
    %38 = vector.extract_strided_slice %33 {offsets = [0, 0], sizes = [8, 8], strides = [1, 1]} : vector<8x32xf32> to vector<8x8xf32>
    %39 = arith.truncf %38 : vector<8x8xf32> to vector<8x8xbf16>
    %40 = vector.extract_strided_slice %34 {offsets = [0, 0], sizes = [8, 8], strides = [1, 1]} : vector<8x32xf32> to vector<8x8xf32>
    %41 = arith.truncf %40 : vector<8x8xf32> to vector<8x8xbf16>
    %42 = vector.extract_strided_slice %35 {offsets = [0, 0], sizes = [8, 8], strides = [1, 1]} : vector<8x32xf32> to vector<8x8xf32>
    %43 = arith.truncf %42 : vector<8x8xf32> to vector<8x8xbf16>
    %cst_19 = arith.constant dense<0.000000e+00> : vector<8x8xf32>
    %44 = tpu.matmul %39, %41, %cst_19 {dimension_numbers = #tpu.dot_dimension_numbers<[1], [1], [0], [0], [0, 0, 1, 0], [], []>} : vector<8x8xbf16>, vector<8x8xbf16>, vector<8x8xf32> -> vector<8x8xf32>
    %c0_i32 = arith.constant 0 : i32
    %45 = vector.broadcast %c0_i32 : i32 to vector<8x8xi32>
    %46 = arith.cmpi eq, %37, %45 : vector<8x8xi32>
    %cst_20 = arith.constant -1.000000e+09 : f32
    %47 = vector.broadcast %cst_20 : f32 to vector<8x8xf32>
    %48 = arith.select %46, %47, %44 : vector<8x8xi1>, vector<8x8xf32>
    %cst_21 = arith.constant dense<0xFF800000> : vector<8xf32>
    %49 = vector.multi_reduction <maximumf>, %48, %cst_21 [1] : vector<8x8xf32> to vector<8xf32>
    %50 = vector.shape_cast %49 : vector<8xf32> to vector<8x1xf32>
    %51 = vector.broadcast %50 : vector<8x1xf32> to vector<8x8xf32>
    %52 = arith.subf %48, %51 : vector<8x8xf32>
    %53 = math.exp %52 : vector<8x8xf32>
    %cst_22 = arith.constant dense<0.000000e+00> : vector<8xf32>
    %54 = vector.multi_reduction <add>, %53, %cst_22 [1] : vector<8x8xf32> to vector<8xf32>
    %55 = vector.shape_cast %54 : vector<8xf32> to vector<8x1xf32>
    %56 = tpu.reciprocal %55 {approx = true} : vector<8x1xf32> -> vector<8x1xf32>
    %57 = vector.broadcast %56 : vector<8x1xf32> to vector<8x8xf32>
    %58 = arith.mulf %53, %57 : vector<8x8xf32>
    %59 = arith.truncf %58 : vector<8x8xf32> to vector<8x8xbf16>
    %cst_23 = arith.constant dense<0.000000e+00> : vector<8x8xf32>
    %60 = tpu.matmul %59, %43, %cst_23 {dimension_numbers = #tpu.dot_dimension_numbers<[1], [0], [0], [1], [0, 0, 1, 1], [], []>} : vector<8x8xbf16>, vector<8x8xbf16>, vector<8x8xf32> -> vector<8x8xf32>
    %61 = vector.extract_strided_slice %33 {offsets = [0, 8], sizes = [8, 8], strides = [1, 1]} : vector<8x32xf32> to vector<8x8xf32>
    %62 = arith.truncf %61 : vector<8x8xf32> to vector<8x8xbf16>
    %63 = vector.extract_strided_slice %34 {offsets = [0, 8], sizes = [8, 8], strides = [1, 1]} : vector<8x32xf32> to vector<8x8xf32>
    %64 = arith.truncf %63 : vector<8x8xf32> to vector<8x8xbf16>
    %65 = vector.extract_strided_slice %35 {offsets = [0, 8], sizes = [8, 8], strides = [1, 1]} : vector<8x32xf32> to vector<8x8xf32>
    %66 = arith.truncf %65 : vector<8x8xf32> to vector<8x8xbf16>
    %cst_24 = arith.constant dense<0.000000e+00> : vector<8x8xf32>
    %67 = tpu.matmul %62, %64, %cst_24 {dimension_numbers = #tpu.dot_dimension_numbers<[1], [1], [0], [0], [0, 0, 1, 0], [], []>} : vector<8x8xbf16>, vector<8x8xbf16>, vector<8x8xf32> -> vector<8x8xf32>
    %c0_i32_25 = arith.constant 0 : i32
    %68 = vector.broadcast %c0_i32_25 : i32 to vector<8x8xi32>
    %69 = arith.cmpi eq, %37, %68 : vector<8x8xi32>
    %cst_26 = arith.constant -1.000000e+09 : f32
    %70 = vector.broadcast %cst_26 : f32 to vector<8x8xf32>
    %71 = arith.select %69, %70, %67 : vector<8x8xi1>, vector<8x8xf32>
    %cst_27 = arith.constant dense<0xFF800000> : vector<8xf32>
    %72 = vector.multi_reduction <maximumf>, %71, %cst_27 [1] : vector<8x8xf32> to vector<8xf32>
    %73 = vector.shape_cast %72 : vector<8xf32> to vector<8x1xf32>
    %74 = vector.broadcast %73 : vector<8x1xf32> to vector<8x8xf32>
    %75 = arith.subf %71, %74 : vector<8x8xf32>
    %76 = math.exp %75 : vector<8x8xf32>
    %cst_28 = arith.constant dense<0.000000e+00> : vector<8xf32>
    %77 = vector.multi_reduction <add>, %76, %cst_28 [1] : vector<8x8xf32> to vector<8xf32>
    %78 = vector.shape_cast %77 : vector<8xf32> to vector<8x1xf32>
    %79 = tpu.reciprocal %78 {approx = true} : vector<8x1xf32> -> vector<8x1xf32>
    %80 = vector.broadcast %79 : vector<8x1xf32> to vector<8x8xf32>
    %81 = arith.mulf %76, %80 : vector<8x8xf32>
    %82 = arith.truncf %81 : vector<8x8xf32> to vector<8x8xbf16>
    %cst_29 = arith.constant dense<0.000000e+00> : vector<8x8xf32>
    %83 = tpu.matmul %82, %66, %cst_29 {dimension_numbers = #tpu.dot_dimension_numbers<[1], [0], [0], [1], [0, 0, 1, 1], [], []>} : vector<8x8xbf16>, vector<8x8xbf16>, vector<8x8xf32> -> vector<8x8xf32>
    %84 = vector.extract_strided_slice %33 {offsets = [0, 16], sizes = [8, 8], strides = [1, 1]} : vector<8x32xf32> to vector<8x8xf32>
    %85 = arith.truncf %84 : vector<8x8xf32> to vector<8x8xbf16>
    %86 = vector.extract_strided_slice %34 {offsets = [0, 16], sizes = [8, 8], strides = [1, 1]} : vector<8x32xf32> to vector<8x8xf32>
    %87 = arith.truncf %86 : vector<8x8xf32> to vector<8x8xbf16>
    %88 = vector.extract_strided_slice %35 {offsets = [0, 16], sizes = [8, 8], strides = [1, 1]} : vector<8x32xf32> to vector<8x8xf32>
    %89 = arith.truncf %88 : vector<8x8xf32> to vector<8x8xbf16>
    %cst_30 = arith.constant dense<0.000000e+00> : vector<8x8xf32>
    %90 = tpu.matmul %85, %87, %cst_30 {dimension_numbers = #tpu.dot_dimension_numbers<[1], [1], [0], [0], [0, 0, 1, 0], [], []>} : vector<8x8xbf16>, vector<8x8xbf16>, vector<8x8xf32> -> vector<8x8xf32>
    %c0_i32_31 = arith.constant 0 : i32
    %91 = vector.broadcast %c0_i32_31 : i32 to vector<8x8xi32>
    %92 = arith.cmpi eq, %37, %91 : vector<8x8xi32>
    %cst_32 = arith.constant -1.000000e+09 : f32
    %93 = vector.broadcast %cst_32 : f32 to vector<8x8xf32>
    %94 = arith.select %92, %93, %90 : vector<8x8xi1>, vector<8x8xf32>
    %cst_33 = arith.constant dense<0xFF800000> : vector<8xf32>
    %95 = vector.multi_reduction <maximumf>, %94, %cst_33 [1] : vector<8x8xf32> to vector<8xf32>
    %96 = vector.shape_cast %95 : vector<8xf32> to vector<8x1xf32>
    %97 = vector.broadcast %96 : vector<8x1xf32> to vector<8x8xf32>
    %98 = arith.subf %94, %97 : vector<8x8xf32>
    %99 = math.exp %98 : vector<8x8xf32>
    %cst_34 = arith.constant dense<0.000000e+00> : vector<8xf32>
    %100 = vector.multi_reduction <add>, %99, %cst_34 [1] : vector<8x8xf32> to vector<8xf32>
    %101 = vector.shape_cast %100 : vector<8xf32> to vector<8x1xf32>
    %102 = tpu.reciprocal %101 {approx = true} : vector<8x1xf32> -> vector<8x1xf32>
    %103 = vector.broadcast %102 : vector<8x1xf32> to vector<8x8xf32>
    %104 = arith.mulf %99, %103 : vector<8x8xf32>
    %105 = arith.truncf %104 : vector<8x8xf32> to vector<8x8xbf16>
    %cst_35 = arith.constant dense<0.000000e+00> : vector<8x8xf32>
    %106 = tpu.matmul %105, %89, %cst_35 {dimension_numbers = #tpu.dot_dimension_numbers<[1], [0], [0], [1], [0, 0, 1, 1], [], []>} : vector<8x8xbf16>, vector<8x8xbf16>, vector<8x8xf32> -> vector<8x8xf32>
    %107 = vector.extract_strided_slice %33 {offsets = [0, 24], sizes = [8, 8], strides = [1, 1]} : vector<8x32xf32> to vector<8x8xf32>
    %108 = arith.truncf %107 : vector<8x8xf32> to vector<8x8xbf16>
    %109 = vector.extract_strided_slice %34 {offsets = [0, 24], sizes = [8, 8], strides = [1, 1]} : vector<8x32xf32> to vector<8x8xf32>
    %110 = arith.truncf %109 : vector<8x8xf32> to vector<8x8xbf16>
    %111 = vector.extract_strided_slice %35 {offsets = [0, 24], sizes = [8, 8], strides = [1, 1]} : vector<8x32xf32> to vector<8x8xf32>
    %112 = arith.truncf %111 : vector<8x8xf32> to vector<8x8xbf16>
    %cst_36 = arith.constant dense<0.000000e+00> : vector<8x8xf32>
    %113 = tpu.matmul %108, %110, %cst_36 {dimension_numbers = #tpu.dot_dimension_numbers<[1], [1], [0], [0], [0, 0, 1, 0], [], []>} : vector<8x8xbf16>, vector<8x8xbf16>, vector<8x8xf32> -> vector<8x8xf32>
    %c0_i32_37 = arith.constant 0 : i32
    %114 = vector.broadcast %c0_i32_37 : i32 to vector<8x8xi32>
    %115 = arith.cmpi eq, %37, %114 : vector<8x8xi32>
    %cst_38 = arith.constant -1.000000e+09 : f32
    %116 = vector.broadcast %cst_38 : f32 to vector<8x8xf32>
    %117 = arith.select %115, %116, %113 : vector<8x8xi1>, vector<8x8xf32>
    %cst_39 = arith.constant dense<0xFF800000> : vector<8xf32>
    %118 = vector.multi_reduction <maximumf>, %117, %cst_39 [1] : vector<8x8xf32> to vector<8xf32>
    %119 = vector.shape_cast %118 : vector<8xf32> to vector<8x1xf32>
    %120 = vector.broadcast %119 : vector<8x1xf32> to vector<8x8xf32>
    %121 = arith.subf %117, %120 : vector<8x8xf32>
    %122 = math.exp %121 : vector<8x8xf32>
    %cst_40 = arith.constant dense<0.000000e+00> : vector<8xf32>
    %123 = vector.multi_reduction <add>, %122, %cst_40 [1] : vector<8x8xf32> to vector<8xf32>
    %124 = vector.shape_cast %123 : vector<8xf32> to vector<8x1xf32>
    %125 = tpu.reciprocal %124 {approx = true} : vector<8x1xf32> -> vector<8x1xf32>
    %126 = vector.broadcast %125 : vector<8x1xf32> to vector<8x8xf32>
    %127 = arith.mulf %122, %126 : vector<8x8xf32>
    %128 = arith.truncf %127 : vector<8x8xf32> to vector<8x8xbf16>
    %cst_41 = arith.constant dense<0.000000e+00> : vector<8x8xf32>
    %129 = tpu.matmul %128, %112, %cst_41 {dimension_numbers = #tpu.dot_dimension_numbers<[1], [0], [0], [1], [0, 0, 1, 1], [], []>} : vector<8x8xbf16>, vector<8x8xbf16>, vector<8x8xf32> -> vector<8x8xf32>
    %130 = tpu.concatenate %60, %83, %106, %129 in 1 : vector<8x8xf32>, vector<8x8xf32>, vector<8x8xf32>, vector<8x8xf32> -> vector<8x32xf32>
    %131 = arith.truncf %130 : vector<8x32xf32> to vector<8x32xbf16>
    %c0_42 = arith.constant 0 : index
    %c0_43 = arith.constant 0 : index
    %132 = vector.load %arg7[%c0_42, %c0_43] : memref<32x32xbf16, #tpu.memory_space<vmem>>, vector<32x32xbf16>
    %cst_44 = arith.constant dense<0.000000e+00> : vector<8x32xf32>
    %133 = tpu.matmul %131, %132, %cst_44 {dimension_numbers = #tpu.dot_dimension_numbers<[1], [0], [0], [1], [0, 0, 1, 1], [], []>} : vector<8x32xbf16>, vector<32x32xbf16>, vector<8x32xf32> -> vector<8x32xf32>
    %c0_45 = arith.constant 0 : index
    %c0_46 = arith.constant 0 : index
    %134 = vector.load %arg8[%c0_45, %c0_46] : memref<1x32xf32, #tpu.memory_space<vmem>>, vector<1x32xf32>
    %135 = vector.broadcast %134 : vector<1x32xf32> to vector<8x32xf32>
    %136 = arith.addf %133, %135 : vector<8x32xf32>
    %137 = arith.addf %1, %136 : vector<8x32xf32>
    %c0_47 = arith.constant 0 : index
    %c0_48 = arith.constant 0 : index
    %c0_49 = arith.constant 0 : index
    %138 = vector.load %arg9[%c0_47, %c0_48, %c0_49] : memref<1x8x32xf32, #tpu.memory_space<vmem>>, vector<1x8x32xf32>
    %139 = vector.shape_cast %138 : vector<1x8x32xf32> to vector<8x32xf32>
    %140 = vector.shape_cast %137 : vector<8x32xf32> to vector<1x8x32xf32>
    tpu.vector_store %arg9[%c0_47, %c0_48, %c0_49], %140 {strides = array<i32>} : memref<1x8x32xf32, #tpu.memory_space<vmem>>, vector<1x8x32xf32>,
    return
  }
  func.func @transform_0(%arg0: i32) -> (i32, i32, i32) {
    %c0_i32 = arith.constant 0 : i32
    %c0_i32_0 = arith.constant 0 : i32
    %c0_i32_1 = arith.constant 0 : i32
    return %arg0, %c0_i32, %c0_i32_0 : i32, i32, i32
  }
  func.func @transform_1(%arg0: i32) -> (i32, i32, i32) {
    %c0_i32 = arith.constant 0 : i32
    %c0_i32_0 = arith.constant 0 : i32
    %c0_i32_1 = arith.constant 0 : i32
    return %arg0, %c0_i32, %c0_i32_0 : i32, i32, i32
  }
  func.func @transform_2(%arg0: i32) -> (i32, i32) {
    %c0_i32 = arith.constant 0 : i32
    %c0_i32_0 = arith.constant 0 : i32
    %c0_i32_1 = arith.constant 0 : i32
    return %c0_i32, %c0_i32_0 : i32, i32
  }
  func.func @transform_3(%arg0: i32) -> (i32, i32) {
    %c0_i32 = arith.constant 0 : i32
    %c0_i32_0 = arith.constant 0 : i32
    %c0_i32_1 = arith.constant 0 : i32
    return %c0_i32, %c0_i32_0 : i32, i32
  }
  func.func @transform_4(%arg0: i32) -> (i32, i32) {
    %c0_i32 = arith.constant 0 : i32
    %c0_i32_0 = arith.constant 0 : i32
    %c0_i32_1 = arith.constant 0 : i32
    return %c0_i32, %c0_i32_0 : i32, i32
  }
  func.func @transform_5(%arg0: i32) -> (i32, i32) {
    %c0_i32 = arith.constant 0 : i32
    %c0_i32_0 = arith.constant 0 : i32
    %c0_i32_1 = arith.constant 0 : i32
    return %c0_i32, %c0_i32_0 : i32, i32
  }
  func.func @transform_6(%arg0: i32) -> (i32, i32) {
    %c0_i32 = arith.constant 0 : i32
    %c0_i32_0 = arith.constant 0 : i32
    %c0_i32_1 = arith.constant 0 : i32
    return %c0_i32, %c0_i32_0 : i32, i32
  }
  func.func @transform_7(%arg0: i32) -> (i32, i32) {
    %c0_i32 = arith.constant 0 : i32
    %c0_i32_0 = arith.constant 0 : i32
    %c0_i32_1 = arith.constant 0 : i32
    return %c0_i32, %c0_i32_0 : i32, i32
  }
  func.func @transform_8(%arg0: i32) -> (i32, i32, i32) {
    %c0_i32 = arith.constant 0 : i32
    %c0_i32_0 = arith.constant 0 : i32
    %c0_i32_1 = arith.constant 0 : i32
    return %arg0, %c0_i32, %c0_i32_0 : i32, i32, i32
  }
}

module attributes {stable_mosaic.version = 11 : i64} {
  func.func @kernel(%arg0: i32, %arg1: memref<1x8x32xf32, #tpu.memory_space<vmem>>, %arg2: memref<1x10x32xf32, #tpu.memory_space<vmem>>, %arg3: memref<1x1x10xi32, #tpu.memory_space<vmem>>, %arg4: memref<1x32xf32, #tpu.memory_space<vmem>>, %arg5: memref<1x32xf32, #tpu.memory_space<vmem>>, %arg6: memref<32x32xbf16, #tpu.memory_space<vmem>>, %arg7: memref<1x32xf32, #tpu.memory_space<vmem>>, %arg8: memref<32x64xbf16, #tpu.memory_space<vmem>>, %arg9: memref<1x64xf32, #tpu.memory_space<vmem>>, %arg10: memref<32x32xbf16, #tpu.memory_space<vmem>>, %arg11: memref<1x32xf32, #tpu.memory_space<vmem>>, %arg12: memref<1x8x32xf32, #tpu.memory_space<vmem>>) attributes {dimension_semantics = [#tpu.dimension_semantics<parallel>], iteration_bounds = array<i64: 2>, scalar_prefetch = 0 : i64, scratch_operands = 0 : i64, tpu.core_type = #tpu.core_type<tc>, window_params = [{transform_indices = @transform_0, window_bounds = array<i64: 1, 8, 32>}, {transform_indices = @transform_1, window_bounds = array<i64: 1, 10, 32>}, {transform_indices = @transform_2, window_bounds = array<i64: 1, 1, 10>}, {pipeline_mode = #tpu.pipeline_mode<synchronous>, transform_indices = @transform_3, window_bounds = array<i64: 1, 32>}, {pipeline_mode = #tpu.pipeline_mode<synchronous>, transform_indices = @transform_4, window_bounds = array<i64: 1, 32>}, {pipeline_mode = #tpu.pipeline_mode<synchronous>, transform_indices = @transform_5, window_bounds = array<i64: 32, 32>}, {pipeline_mode = #tpu.pipeline_mode<synchronous>, transform_indices = @transform_6, window_bounds = array<i64: 1, 32>}, {pipeline_mode = #tpu.pipeline_mode<synchronous>, transform_indices = @transform_7, window_bounds = array<i64: 32, 64>}, {pipeline_mode = #tpu.pipeline_mode<synchronous>, transform_indices = @transform_8, window_bounds = array<i64: 1, 64>}, {pipeline_mode = #tpu.pipeline_mode<synchronous>, transform_indices = @transform_9, window_bounds = array<i64: 32, 32>}, {pipeline_mode = #tpu.pipeline_mode<synchronous>, transform_indices = @transform_10, window_bounds = array<i64: 1, 32>}, {transform_indices = @transform_11, window_bounds = array<i64: 1, 8, 32>}]} {
    %c0 = arith.constant 0 : index
    %c0_0 = arith.constant 0 : index
    %c0_1 = arith.constant 0 : index
    %0 = vector.load %arg1[%c0, %c0_0, %c0_1] : memref<1x8x32xf32, #tpu.memory_space<vmem>>, vector<1x8x32xf32>
    %1 = vector.shape_cast %0 : vector<1x8x32xf32> to vector<8x32xf32>
    %c0_2 = arith.constant 0 : index
    %c0_3 = arith.constant 0 : index
    %2 = vector.load %arg4[%c0_2, %c0_3] : memref<1x32xf32, #tpu.memory_space<vmem>>, vector<1x32xf32>
    %c0_4 = arith.constant 0 : index
    %c0_5 = arith.constant 0 : index
    %3 = vector.load %arg5[%c0_4, %c0_5] : memref<1x32xf32, #tpu.memory_space<vmem>>, vector<1x32xf32>
    %cst = arith.constant dense<0.000000e+00> : vector<8xf32>
    %4 = vector.multi_reduction <add>, %1, %cst [1] : vector<8x32xf32> to vector<8xf32>
    %5 = vector.shape_cast %4 : vector<8xf32> to vector<8x1xf32>
    %cst_6 = arith.constant 3.200000e+01 : f32
    %6 = vector.broadcast %cst_6 : f32 to vector<8x1xf32>
    %7 = arith.divf %5, %6 : vector<8x1xf32>
    %8 = vector.broadcast %7 : vector<8x1xf32> to vector<8x32xf32>
    %9 = arith.subf %1, %8 : vector<8x32xf32>
    %10 = arith.mulf %9, %9 : vector<8x32xf32>
    %cst_7 = arith.constant dense<0.000000e+00> : vector<8xf32>
    %11 = vector.multi_reduction <add>, %10, %cst_7 [1] : vector<8x32xf32> to vector<8xf32>
    %12 = vector.shape_cast %11 : vector<8xf32> to vector<8x1xf32>
    %cst_8 = arith.constant 0.0322580636 : f32
    %13 = vector.broadcast %cst_8 : f32 to vector<8x1xf32>
    %14 = arith.mulf %12, %13 : vector<8x1xf32>
    %15 = math.sqrt %14 : vector<8x1xf32>
    %cst_9 = arith.constant 9.99999997E-7 : f32
    %16 = vector.broadcast %cst_9 : f32 to vector<8x1xf32>
    %17 = arith.addf %15, %16 : vector<8x1xf32>
    %18 = tpu.reciprocal %17 {approx = true} : vector<8x1xf32> -> vector<8x1xf32>
    %19 = vector.broadcast %18 : vector<8x1xf32> to vector<8x32xf32>
    %20 = arith.mulf %9, %19 : vector<8x32xf32>
    %21 = vector.broadcast %2 : vector<1x32xf32> to vector<8x32xf32>
    %22 = arith.mulf %21, %20 : vector<8x32xf32>
    %23 = vector.broadcast %3 : vector<1x32xf32> to vector<8x32xf32>
    %24 = arith.addf %22, %23 : vector<8x32xf32>
    %c0_10 = arith.constant 0 : index
    %c0_11 = arith.constant 0 : index
    %c0_12 = arith.constant 0 : index
    %25 = vector.load %arg2[%c0_10, %c0_11, %c0_12] : memref<1x10x32xf32, #tpu.memory_space<vmem>>, vector<1x10x32xf32>
    %26 = vector.shape_cast %25 : vector<1x10x32xf32> to vector<10x32xf32>
    %27 = arith.truncf %26 : vector<10x32xf32> to vector<10x32xbf16>
    %28 = arith.truncf %24 : vector<8x32xf32> to vector<8x32xbf16>
    %c0_13 = arith.constant 0 : index
    %c0_14 = arith.constant 0 : index
    %29 = vector.load %arg6[%c0_13, %c0_14] : memref<32x32xbf16, #tpu.memory_space<vmem>>, vector<32x32xbf16>
    %cst_15 = arith.constant dense<0.000000e+00> : vector<8x32xf32>
    %30 = tpu.matmul %28, %29, %cst_15 {dimension_numbers = #tpu.dot_dimension_numbers<[1], [0], [0], [1], [0, 0, 1, 1], [], []>} : vector<8x32xbf16>, vector<32x32xbf16>, vector<8x32xf32> -> vector<8x32xf32>
    %c0_16 = arith.constant 0 : index
    %c0_17 = arith.constant 0 : index
    %31 = vector.load %arg7[%c0_16, %c0_17] : memref<1x32xf32, #tpu.memory_space<vmem>>, vector<1x32xf32>
    %32 = vector.broadcast %31 : vector<1x32xf32> to vector<8x32xf32>
    %33 = arith.addf %30, %32 : vector<8x32xf32>
    %cst_18 = arith.constant 0.353553385 : f32
    %34 = vector.broadcast %cst_18 : f32 to vector<8x32xf32>
    %35 = arith.mulf %33, %34 : vector<8x32xf32>
    %c0_19 = arith.constant 0 : index
    %c0_20 = arith.constant 0 : index
    %36 = vector.load %arg8[%c0_19, %c0_20] : memref<32x64xbf16, #tpu.memory_space<vmem>>, vector<32x64xbf16>
    %cst_21 = arith.constant dense<0.000000e+00> : vector<10x64xf32>
    %37 = tpu.matmul %27, %36, %cst_21 {dimension_numbers = #tpu.dot_dimension_numbers<[1], [0], [0], [1], [0, 0, 1, 1], [], []>} : vector<10x32xbf16>, vector<32x64xbf16>, vector<10x64xf32> -> vector<10x64xf32>
    %c0_22 = arith.constant 0 : index
    %c0_23 = arith.constant 0 : index
    %38 = vector.load %arg9[%c0_22, %c0_23] : memref<1x64xf32, #tpu.memory_space<vmem>>, vector<1x64xf32>
    %39 = vector.broadcast %38 : vector<1x64xf32> to vector<10x64xf32>
    %40 = arith.addf %37, %39 : vector<10x64xf32>
    %41 = vector.extract_strided_slice %40 {offsets = [0, 0], sizes = [10, 32], strides = [1, 1]} : vector<10x64xf32> to vector<10x32xf32>
    %42 = vector.extract_strided_slice %40 {offsets = [0, 32], sizes = [10, 32], strides = [1, 1]} : vector<10x64xf32> to vector<10x32xf32>
    %c0_24 = arith.constant 0 : index
    %c0_25 = arith.constant 0 : index
    %c0_26 = arith.constant 0 : index
    %43 = vector.load %arg3[%c0_24, %c0_25, %c0_26] : memref<1x1x10xi32, #tpu.memory_space<vmem>>, vector<1x1x10xi32>
    %44 = vector.shape_cast %43 : vector<1x1x10xi32> to vector<1x10xi32>
    %45 = vector.extract_strided_slice %35 {offsets = [0, 0], sizes = [8, 8], strides = [1, 1]} : vector<8x32xf32> to vector<8x8xf32>
    %46 = arith.truncf %45 : vector<8x8xf32> to vector<8x8xbf16>
    %47 = vector.extract_strided_slice %41 {offsets = [0, 0], sizes = [10, 8], strides = [1, 1]} : vector<10x32xf32> to vector<10x8xf32>
    %48 = arith.truncf %47 : vector<10x8xf32> to vector<10x8xbf16>
    %49 = vector.extract_strided_slice %42 {offsets = [0, 0], sizes = [10, 8], strides = [1, 1]} : vector<10x32xf32> to vector<10x8xf32>
    %50 = arith.truncf %49 : vector<10x8xf32> to vector<10x8xbf16>
    %cst_27 = arith.constant dense<0.000000e+00> : vector<8x10xf32>
    %51 = tpu.matmul %46, %48, %cst_27 {dimension_numbers = #tpu.dot_dimension_numbers<[1], [1], [0], [0], [0, 0, 1, 0], [], []>} : vector<8x8xbf16>, vector<10x8xbf16>, vector<8x10xf32> -> vector<8x10xf32>
    %c0_i32 = arith.constant 0 : i32
    %52 = vector.broadcast %c0_i32 : i32 to vector<1x10xi32>
    %53 = arith.cmpi eq, %44, %52 : vector<1x10xi32>
    %cst_28 = arith.constant -1.000000e+09 : f32
    %54 = vector.shape_cast %53 : vector<1x10xi1> to vector<1x10xi1>
    %55 = vector.broadcast %54 : vector<1x10xi1> to vector<8x10xi1>
    %56 = vector.broadcast %cst_28 : f32 to vector<8x10xf32>
    %57 = arith.select %55, %56, %51 : vector<8x10xi1>, vector<8x10xf32>
    %cst_29 = arith.constant dense<0xFF800000> : vector<8xf32>
    %58 = vector.multi_reduction <maximumf>, %57, %cst_29 [1] : vector<8x10xf32> to vector<8xf32>
    %59 = vector.shape_cast %58 : vector<8xf32> to vector<8x1xf32>
    %60 = vector.broadcast %59 : vector<8x1xf32> to vector<8x10xf32>
    %61 = arith.subf %57, %60 : vector<8x10xf32>
    %62 = math.exp %61 : vector<8x10xf32>
    %cst_30 = arith.constant dense<0.000000e+00> : vector<8xf32>
    %63 = vector.multi_reduction <add>, %62, %cst_30 [1] : vector<8x10xf32> to vector<8xf32>
    %64 = vector.shape_cast %63 : vector<8xf32> to vector<8x1xf32>
    %65 = tpu.reciprocal %64 {approx = true} : vector<8x1xf32> -> vector<8x1xf32>
    %66 = vector.broadcast %65 : vector<8x1xf32> to vector<8x10xf32>
    %67 = arith.mulf %62, %66 : vector<8x10xf32>
    %68 = arith.truncf %67 : vector<8x10xf32> to vector<8x10xbf16>
    %cst_31 = arith.constant dense<0.000000e+00> : vector<8x8xf32>
    %69 = tpu.matmul %68, %50, %cst_31 {dimension_numbers = #tpu.dot_dimension_numbers<[1], [0], [0], [1], [0, 0, 1, 1], [], []>} : vector<8x10xbf16>, vector<10x8xbf16>, vector<8x8xf32> -> vector<8x8xf32>
    %70 = vector.extract_strided_slice %35 {offsets = [0, 8], sizes = [8, 8], strides = [1, 1]} : vector<8x32xf32> to vector<8x8xf32>
    %71 = arith.truncf %70 : vector<8x8xf32> to vector<8x8xbf16>
    %72 = vector.extract_strided_slice %41 {offsets = [0, 8], sizes = [10, 8], strides = [1, 1]} : vector<10x32xf32> to vector<10x8xf32>
    %73 = arith.truncf %72 : vector<10x8xf32> to vector<10x8xbf16>
    %74 = vector.extract_strided_slice %42 {offsets = [0, 8], sizes = [10, 8], strides = [1, 1]} : vector<10x32xf32> to vector<10x8xf32>
    %75 = arith.truncf %74 : vector<10x8xf32> to vector<10x8xbf16>
    %cst_32 = arith.constant dense<0.000000e+00> : vector<8x10xf32>
    %76 = tpu.matmul %71, %73, %cst_32 {dimension_numbers = #tpu.dot_dimension_numbers<[1], [1], [0], [0], [0, 0, 1, 0], [], []>} : vector<8x8xbf16>, vector<10x8xbf16>, vector<8x10xf32> -> vector<8x10xf32>
    %c0_i32_33 = arith.constant 0 : i32
    %77 = vector.broadcast %c0_i32_33 : i32 to vector<1x10xi32>
    %78 = arith.cmpi eq, %44, %77 : vector<1x10xi32>
    %cst_34 = arith.constant -1.000000e+09 : f32
    %79 = vector.shape_cast %78 : vector<1x10xi1> to vector<1x10xi1>
    %80 = vector.broadcast %79 : vector<1x10xi1> to vector<8x10xi1>
    %81 = vector.broadcast %cst_34 : f32 to vector<8x10xf32>
    %82 = arith.select %80, %81, %76 : vector<8x10xi1>, vector<8x10xf32>
    %cst_35 = arith.constant dense<0xFF800000> : vector<8xf32>
    %83 = vector.multi_reduction <maximumf>, %82, %cst_35 [1] : vector<8x10xf32> to vector<8xf32>
    %84 = vector.shape_cast %83 : vector<8xf32> to vector<8x1xf32>
    %85 = vector.broadcast %84 : vector<8x1xf32> to vector<8x10xf32>
    %86 = arith.subf %82, %85 : vector<8x10xf32>
    %87 = math.exp %86 : vector<8x10xf32>
    %cst_36 = arith.constant dense<0.000000e+00> : vector<8xf32>
    %88 = vector.multi_reduction <add>, %87, %cst_36 [1] : vector<8x10xf32> to vector<8xf32>
    %89 = vector.shape_cast %88 : vector<8xf32> to vector<8x1xf32>
    %90 = tpu.reciprocal %89 {approx = true} : vector<8x1xf32> -> vector<8x1xf32>
    %91 = vector.broadcast %90 : vector<8x1xf32> to vector<8x10xf32>
    %92 = arith.mulf %87, %91 : vector<8x10xf32>
    %93 = arith.truncf %92 : vector<8x10xf32> to vector<8x10xbf16>
    %cst_37 = arith.constant dense<0.000000e+00> : vector<8x8xf32>
    %94 = tpu.matmul %93, %75, %cst_37 {dimension_numbers = #tpu.dot_dimension_numbers<[1], [0], [0], [1], [0, 0, 1, 1], [], []>} : vector<8x10xbf16>, vector<10x8xbf16>, vector<8x8xf32> -> vector<8x8xf32>
    %95 = vector.extract_strided_slice %35 {offsets = [0, 16], sizes = [8, 8], strides = [1, 1]} : vector<8x32xf32> to vector<8x8xf32>
    %96 = arith.truncf %95 : vector<8x8xf32> to vector<8x8xbf16>
    %97 = vector.extract_strided_slice %41 {offsets = [0, 16], sizes = [10, 8], strides = [1, 1]} : vector<10x32xf32> to vector<10x8xf32>
    %98 = arith.truncf %97 : vector<10x8xf32> to vector<10x8xbf16>
    %99 = vector.extract_strided_slice %42 {offsets = [0, 16], sizes = [10, 8], strides = [1, 1]} : vector<10x32xf32> to vector<10x8xf32>
    %100 = arith.truncf %99 : vector<10x8xf32> to vector<10x8xbf16>
    %cst_38 = arith.constant dense<0.000000e+00> : vector<8x10xf32>
    %101 = tpu.matmul %96, %98, %cst_38 {dimension_numbers = #tpu.dot_dimension_numbers<[1], [1], [0], [0], [0, 0, 1, 0], [], []>} : vector<8x8xbf16>, vector<10x8xbf16>, vector<8x10xf32> -> vector<8x10xf32>
    %c0_i32_39 = arith.constant 0 : i32
    %102 = vector.broadcast %c0_i32_39 : i32 to vector<1x10xi32>
    %103 = arith.cmpi eq, %44, %102 : vector<1x10xi32>
    %cst_40 = arith.constant -1.000000e+09 : f32
    %104 = vector.shape_cast %103 : vector<1x10xi1> to vector<1x10xi1>
    %105 = vector.broadcast %104 : vector<1x10xi1> to vector<8x10xi1>
    %106 = vector.broadcast %cst_40 : f32 to vector<8x10xf32>
    %107 = arith.select %105, %106, %101 : vector<8x10xi1>, vector<8x10xf32>
    %cst_41 = arith.constant dense<0xFF800000> : vector<8xf32>
    %108 = vector.multi_reduction <maximumf>, %107, %cst_41 [1] : vector<8x10xf32> to vector<8xf32>
    %109 = vector.shape_cast %108 : vector<8xf32> to vector<8x1xf32>
    %110 = vector.broadcast %109 : vector<8x1xf32> to vector<8x10xf32>
    %111 = arith.subf %107, %110 : vector<8x10xf32>
    %112 = math.exp %111 : vector<8x10xf32>
    %cst_42 = arith.constant dense<0.000000e+00> : vector<8xf32>
    %113 = vector.multi_reduction <add>, %112, %cst_42 [1] : vector<8x10xf32> to vector<8xf32>
    %114 = vector.shape_cast %113 : vector<8xf32> to vector<8x1xf32>
    %115 = tpu.reciprocal %114 {approx = true} : vector<8x1xf32> -> vector<8x1xf32>
    %116 = vector.broadcast %115 : vector<8x1xf32> to vector<8x10xf32>
    %117 = arith.mulf %112, %116 : vector<8x10xf32>
    %118 = arith.truncf %117 : vector<8x10xf32> to vector<8x10xbf16>
    %cst_43 = arith.constant dense<0.000000e+00> : vector<8x8xf32>
    %119 = tpu.matmul %118, %100, %cst_43 {dimension_numbers = #tpu.dot_dimension_numbers<[1], [0], [0], [1], [0, 0, 1, 1], [], []>} : vector<8x10xbf16>, vector<10x8xbf16>, vector<8x8xf32> -> vector<8x8xf32>
    %120 = vector.extract_strided_slice %35 {offsets = [0, 24], sizes = [8, 8], strides = [1, 1]} : vector<8x32xf32> to vector<8x8xf32>
    %121 = arith.truncf %120 : vector<8x8xf32> to vector<8x8xbf16>
    %122 = vector.extract_strided_slice %41 {offsets = [0, 24], sizes = [10, 8], strides = [1, 1]} : vector<10x32xf32> to vector<10x8xf32>
    %123 = arith.truncf %122 : vector<10x8xf32> to vector<10x8xbf16>
    %124 = vector.extract_strided_slice %42 {offsets = [0, 24], sizes = [10, 8], strides = [1, 1]} : vector<10x32xf32> to vector<10x8xf32>
    %125 = arith.truncf %124 : vector<10x8xf32> to vector<10x8xbf16>
    %cst_44 = arith.constant dense<0.000000e+00> : vector<8x10xf32>
    %126 = tpu.matmul %121, %123, %cst_44 {dimension_numbers = #tpu.dot_dimension_numbers<[1], [1], [0], [0], [0, 0, 1, 0], [], []>} : vector<8x8xbf16>, vector<10x8xbf16>, vector<8x10xf32> -> vector<8x10xf32>
    %c0_i32_45 = arith.constant 0 : i32
    %127 = vector.broadcast %c0_i32_45 : i32 to vector<1x10xi32>
    %128 = arith.cmpi eq, %44, %127 : vector<1x10xi32>
    %cst_46 = arith.constant -1.000000e+09 : f32
    %129 = vector.shape_cast %128 : vector<1x10xi1> to vector<1x10xi1>
    %130 = vector.broadcast %129 : vector<1x10xi1> to vector<8x10xi1>
    %131 = vector.broadcast %cst_46 : f32 to vector<8x10xf32>
    %132 = arith.select %130, %131, %126 : vector<8x10xi1>, vector<8x10xf32>
    %cst_47 = arith.constant dense<0xFF800000> : vector<8xf32>
    %133 = vector.multi_reduction <maximumf>, %132, %cst_47 [1] : vector<8x10xf32> to vector<8xf32>
    %134 = vector.shape_cast %133 : vector<8xf32> to vector<8x1xf32>
    %135 = vector.broadcast %134 : vector<8x1xf32> to vector<8x10xf32>
    %136 = arith.subf %132, %135 : vector<8x10xf32>
    %137 = math.exp %136 : vector<8x10xf32>
    %cst_48 = arith.constant dense<0.000000e+00> : vector<8xf32>
    %138 = vector.multi_reduction <add>, %137, %cst_48 [1] : vector<8x10xf32> to vector<8xf32>
    %139 = vector.shape_cast %138 : vector<8xf32> to vector<8x1xf32>
    %140 = tpu.reciprocal %139 {approx = true} : vector<8x1xf32> -> vector<8x1xf32>
    %141 = vector.broadcast %140 : vector<8x1xf32> to vector<8x10xf32>
    %142 = arith.mulf %137, %141 : vector<8x10xf32>
    %143 = arith.truncf %142 : vector<8x10xf32> to vector<8x10xbf16>
    %cst_49 = arith.constant dense<0.000000e+00> : vector<8x8xf32>
    %144 = tpu.matmul %143, %125, %cst_49 {dimension_numbers = #tpu.dot_dimension_numbers<[1], [0], [0], [1], [0, 0, 1, 1], [], []>} : vector<8x10xbf16>, vector<10x8xbf16>, vector<8x8xf32> -> vector<8x8xf32>
    %145 = tpu.concatenate %69, %94, %119, %144 in 1 : vector<8x8xf32>, vector<8x8xf32>, vector<8x8xf32>, vector<8x8xf32> -> vector<8x32xf32>
    %146 = arith.truncf %145 : vector<8x32xf32> to vector<8x32xbf16>
    %c0_50 = arith.constant 0 : index
    %c0_51 = arith.constant 0 : index
    %147 = vector.load %arg10[%c0_50, %c0_51] : memref<32x32xbf16, #tpu.memory_space<vmem>>, vector<32x32xbf16>
    %cst_52 = arith.constant dense<0.000000e+00> : vector<8x32xf32>
    %148 = tpu.matmul %146, %147, %cst_52 {dimension_numbers = #tpu.dot_dimension_numbers<[1], [0], [0], [1], [0, 0, 1, 1], [], []>} : vector<8x32xbf16>, vector<32x32xbf16>, vector<8x32xf32> -> vector<8x32xf32>
    %c0_53 = arith.constant 0 : index
    %c0_54 = arith.constant 0 : index
    %149 = vector.load %arg11[%c0_53, %c0_54] : memref<1x32xf32, #tpu.memory_space<vmem>>, vector<1x32xf32>
    %150 = vector.broadcast %149 : vector<1x32xf32> to vector<8x32xf32>
    %151 = arith.addf %148, %150 : vector<8x32xf32>
    %152 = arith.addf %1, %151 : vector<8x32xf32>
    %c0_55 = arith.constant 0 : index
    %c0_56 = arith.constant 0 : index
    %c0_57 = arith.constant 0 : index
    %153 = vector.load %arg12[%c0_55, %c0_56, %c0_57] : memref<1x8x32xf32, #tpu.memory_space<vmem>>, vector<1x8x32xf32>
    %154 = vector.shape_cast %153 : vector<1x8x32xf32> to vector<8x32xf32>
    %155 = vector.shape_cast %152 : vector<8x32xf32> to vector<1x8x32xf32>
    tpu.vector_store %arg12[%c0_55, %c0_56, %c0_57], %155 {strides = array<i32>} : memref<1x8x32xf32, #tpu.memory_space<vmem>>, vector<1x8x32xf32>,
    return
  }
  func.func @transform_0(%arg0: i32) -> (i32, i32, i32) {
    %c0_i32 = arith.constant 0 : i32
    %c0_i32_0 = arith.constant 0 : i32
    %c0_i32_1 = arith.constant 0 : i32
    return %arg0, %c0_i32, %c0_i32_0 : i32, i32, i32
  }
  func.func @transform_1(%arg0: i32) -> (i32, i32, i32) {
    %c0_i32 = arith.constant 0 : i32
    %c0_i32_0 = arith.constant 0 : i32
    %c0_i32_1 = arith.constant 0 : i32
    return %arg0, %c0_i32, %c0_i32_0 : i32, i32, i32
  }
  func.func @transform_2(%arg0: i32) -> (i32, i32, i32) {
    %c0_i32 = arith.constant 0 : i32
    %c0_i32_0 = arith.constant 0 : i32
    %c0_i32_1 = arith.constant 0 : i32
    return %arg0, %c0_i32, %c0_i32_0 : i32, i32, i32
  }
  func.func @transform_3(%arg0: i32) -> (i32, i32) {
    %c0_i32 = arith.constant 0 : i32
    %c0_i32_0 = arith.constant 0 : i32
    %c0_i32_1 = arith.constant 0 : i32
    return %c0_i32, %c0_i32_0 : i32, i32
  }
  func.func @transform_4(%arg0: i32) -> (i32, i32) {
    %c0_i32 = arith.constant 0 : i32
    %c0_i32_0 = arith.constant 0 : i32
    %c0_i32_1 = arith.constant 0 : i32
    return %c0_i32, %c0_i32_0 : i32, i32
  }
  func.func @transform_5(%arg0: i32) -> (i32, i32) {
    %c0_i32 = arith.constant 0 : i32
    %c0_i32_0 = arith.constant 0 : i32
    %c0_i32_1 = arith.constant 0 : i32
    return %c0_i32, %c0_i32_0 : i32, i32
  }
  func.func @transform_6(%arg0: i32) -> (i32, i32) {
    %c0_i32 = arith.constant 0 : i32
    %c0_i32_0 = arith.constant 0 : i32
    %c0_i32_1 = arith.constant 0 : i32
    return %c0_i32, %c0_i32_0 : i32, i32
  }
  func.func @transform_7(%arg0: i32) -> (i32, i32) {
    %c0_i32 = arith.constant 0 : i32
    %c0_i32_0 = arith.constant 0 : i32
    %c0_i32_1 = arith.constant 0 : i32
    return %c0_i32, %c0_i32_0 : i32, i32
  }
  func.func @transform_8(%arg0: i32) -> (i32, i32) {
    %c0_i32 = arith.constant 0 : i32
    %c0_i32_0 = arith.constant 0 : i32
    %c0_i32_1 = arith.constant 0 : i32
    return %c0_i32, %c0_i32_0 : i32, i32
  }
  func.func @transform_9(%arg0: i32) -> (i32, i32) {
    %c0_i32 = arith.constant 0 : i32
    %c0_i32_0 = arith.constant 0 : i32
    %c0_i32_1 = arith.constant 0 : i32
    return %c0_i32, %c0_i32_0 : i32, i32
  }
  func.func @transform_10(%arg0: i32) -> (i32, i32) {
    %c0_i32 = arith.constant 0 : i32
    %c0_i32_0 = arith.constant 0 : i32
    %c0_i32_1 = arith.constant 0 : i32
    return %c0_i32, %c0_i32_0 : i32, i32
  }
  func.func @transform_11(%arg0: i32) -> (i32, i32, i32) {
    %c0_i32 = arith.constant 0 : i32
    %c0_i32_0 = arith.constant 0 : i32
    %c0_i32_1 = arith.constant 0 : i32
    return %arg0, %c0_i32, %c0_i32_0 : i32, i32, i32
  }
}

module attributes {stable_mosaic.version = 11 : i64} {
  func.func @ffn_kernel(%arg0: i32, %arg1: memref<8x32xf32, #tpu.memory_space<vmem>>, %arg2: memref<1x32xf32, #tpu.memory_space<vmem>>, %arg3: memref<1x32xf32, #tpu.memory_space<vmem>>, %arg4: memref<32x64xbf16, #tpu.memory_space<vmem>>, %arg5: memref<1x64xf32, #tpu.memory_space<vmem>>, %arg6: memref<64x32xbf16, #tpu.memory_space<vmem>>, %arg7: memref<1x32xf32, #tpu.memory_space<vmem>>, %arg8: memref<8x32xf32, #tpu.memory_space<vmem>>) attributes {dimension_semantics = [#tpu.dimension_semantics<parallel>], iteration_bounds = array<i64: 2>, scalar_prefetch = 0 : i64, scratch_operands = 0 : i64, tpu.core_type = #tpu.core_type<tc>, window_params = [{transform_indices = @transform_0, window_bounds = array<i64: 8, 32>}, {pipeline_mode = #tpu.pipeline_mode<synchronous>, transform_indices = @transform_1, window_bounds = array<i64: 1, 32>}, {pipeline_mode = #tpu.pipeline_mode<synchronous>, transform_indices = @transform_2, window_bounds = array<i64: 1, 32>}, {pipeline_mode = #tpu.pipeline_mode<synchronous>, transform_indices = @transform_3, window_bounds = array<i64: 32, 64>}, {pipeline_mode = #tpu.pipeline_mode<synchronous>, transform_indices = @transform_4, window_bounds = array<i64: 1, 64>}, {pipeline_mode = #tpu.pipeline_mode<synchronous>, transform_indices = @transform_5, window_bounds = array<i64: 64, 32>}, {pipeline_mode = #tpu.pipeline_mode<synchronous>, transform_indices = @transform_6, window_bounds = array<i64: 1, 32>}, {transform_indices = @transform_7, window_bounds = array<i64: 8, 32>}]} {
    %c0 = arith.constant 0 : index
    %c0_0 = arith.constant 0 : index
    %0 = vector.load %arg1[%c0, %c0_0] : memref<8x32xf32, #tpu.memory_space<vmem>>, vector<8x32xf32>
    %c0_1 = arith.constant 0 : index
    %c0_2 = arith.constant 0 : index
    %1 = vector.load %arg2[%c0_1, %c0_2] : memref<1x32xf32, #tpu.memory_space<vmem>>, vector<1x32xf32>
    %c0_3 = arith.constant 0 : index
    %c0_4 = arith.constant 0 : index
    %2 = vector.load %arg3[%c0_3, %c0_4] : memref<1x32xf32, #tpu.memory_space<vmem>>, vector<1x32xf32>
    %cst = arith.constant dense<0.000000e+00> : vector<8xf32>
    %3 = vector.multi_reduction <add>, %0, %cst [1] : vector<8x32xf32> to vector<8xf32>
    %4 = vector.shape_cast %3 : vector<8xf32> to vector<8x1xf32>
    %cst_5 = arith.constant 3.200000e+01 : f32
    %5 = vector.broadcast %cst_5 : f32 to vector<8x1xf32>
    %6 = arith.divf %4, %5 : vector<8x1xf32>
    %7 = vector.broadcast %6 : vector<8x1xf32> to vector<8x32xf32>
    %8 = arith.subf %0, %7 : vector<8x32xf32>
    %9 = arith.mulf %8, %8 : vector<8x32xf32>
    %cst_6 = arith.constant dense<0.000000e+00> : vector<8xf32>
    %10 = vector.multi_reduction <add>, %9, %cst_6 [1] : vector<8x32xf32> to vector<8xf32>
    %11 = vector.shape_cast %10 : vector<8xf32> to vector<8x1xf32>
    %cst_7 = arith.constant 0.0322580636 : f32
    %12 = vector.broadcast %cst_7 : f32 to vector<8x1xf32>
    %13 = arith.mulf %11, %12 : vector<8x1xf32>
    %14 = math.sqrt %13 : vector<8x1xf32>
    %cst_8 = arith.constant 9.99999997E-7 : f32
    %15 = vector.broadcast %cst_8 : f32 to vector<8x1xf32>
    %16 = arith.addf %14, %15 : vector<8x1xf32>
    %17 = tpu.reciprocal %16 {approx = true} : vector<8x1xf32> -> vector<8x1xf32>
    %18 = vector.broadcast %17 : vector<8x1xf32> to vector<8x32xf32>
    %19 = arith.mulf %8, %18 : vector<8x32xf32>
    %20 = vector.broadcast %1 : vector<1x32xf32> to vector<8x32xf32>
    %21 = arith.mulf %20, %19 : vector<8x32xf32>
    %22 = vector.broadcast %2 : vector<1x32xf32> to vector<8x32xf32>
    %23 = arith.addf %21, %22 : vector<8x32xf32>
    %24 = arith.truncf %23 : vector<8x32xf32> to vector<8x32xbf16>
    %c0_9 = arith.constant 0 : index
    %c0_10 = arith.constant 0 : index
    %25 = vector.load %arg4[%c0_9, %c0_10] : memref<32x64xbf16, #tpu.memory_space<vmem>>, vector<32x64xbf16>
    %cst_11 = arith.constant dense<0.000000e+00> : vector<8x64xf32>
    %26 = tpu.matmul %24, %25, %cst_11 {dimension_numbers = #tpu.dot_dimension_numbers<[1], [0], [0], [1], [0, 0, 1, 1], [], []>} : vector<8x32xbf16>, vector<32x64xbf16>, vector<8x64xf32> -> vector<8x64xf32>
    %c0_12 = arith.constant 0 : index
    %c0_13 = arith.constant 0 : index
    %27 = vector.load %arg5[%c0_12, %c0_13] : memref<1x64xf32, #tpu.memory_space<vmem>>, vector<1x64xf32>
    %28 = vector.broadcast %27 : vector<1x64xf32> to vector<8x64xf32>
    %29 = arith.addf %26, %28 : vector<8x64xf32>
    %cst_14 = arith.constant 0.000000e+00 : f32
    %30 = vector.broadcast %cst_14 : f32 to vector<8x64xf32>
    %31 = arith.maximumf %29, %30 : vector<8x64xf32>
    %32 = arith.truncf %31 : vector<8x64xf32> to vector<8x64xbf16>
    %c0_15 = arith.constant 0 : index
    %c0_16 = arith.constant 0 : index
    %33 = vector.load %arg6[%c0_15, %c0_16] : memref<64x32xbf16, #tpu.memory_space<vmem>>, vector<64x32xbf16>
    %cst_17 = arith.constant dense<0.000000e+00> : vector<8x32xf32>
    %34 = tpu.matmul %32, %33, %cst_17 {dimension_numbers = #tpu.dot_dimension_numbers<[1], [0], [0], [1], [0, 0, 1, 1], [], []>} : vector<8x64xbf16>, vector<64x32xbf16>, vector<8x32xf32> -> vector<8x32xf32>
    %c0_18 = arith.constant 0 : index
    %c0_19 = arith.constant 0 : index
    %35 = vector.load %arg7[%c0_18, %c0_19] : memref<1x32xf32, #tpu.memory_space<vmem>>, vector<1x32xf32>
    %36 = vector.broadcast %35 : vector<1x32xf32> to vector<8x32xf32>
    %37 = arith.addf %34, %36 : vector<8x32xf32>
    %38 = arith.addf %0, %37 : vector<8x32xf32>
    %c0_20 = arith.constant 0 : index
    %c0_21 = arith.constant 0 : index
    %39 = vector.load %arg8[%c0_20, %c0_21] : memref<8x32xf32, #tpu.memory_space<vmem>>, vector<8x32xf32>
    tpu.vector_store %arg8[%c0_20, %c0_21], %38 {strides = array<i32>} : memref<8x32xf32, #tpu.memory_space<vmem>>, vector<8x32xf32>,
    return
  }
  func.func @transform_0(%arg0: i32) -> (i32, i32) {
    %c0_i32 = arith.constant 0 : i32
    %c0_i32_0 = arith.constant 0 : i32
    return %arg0, %c0_i32 : i32, i32
  }
  func.func @transform_1(%arg0: i32) -> (i32, i32) {
    %c0_i32 = arith.constant 0 : i32
    %c0_i32_0 = arith.constant 0 : i32
    %c0_i32_1 = arith.constant 0 : i32
    return %c0_i32, %c0_i32_0 : i32, i32
  }
  func.func @transform_2(%arg0: i32) -> (i32, i32) {
    %c0_i32 = arith.constant 0 : i32
    %c0_i32_0 = arith.constant 0 : i32
    %c0_i32_1 = arith.constant 0 : i32
    return %c0_i32, %c0_i32_0 : i32, i32
  }
  func.func @transform_3(%arg0: i32) -> (i32, i32) {
    %c0_i32 = arith.constant 0 : i32
    %c0_i32_0 = arith.constant 0 : i32
    %c0_i32_1 = arith.constant 0 : i32
    return %c0_i32, %c0_i32_0 : i32, i32
  }
  func.func @transform_4(%arg0: i32) -> (i32, i32) {
    %c0_i32 = arith.constant 0 : i32
    %c0_i32_0 = arith.constant 0 : i32
    %c0_i32_1 = arith.constant 0 : i32
    return %c0_i32, %c0_i32_0 : i32, i32
  }
  func.func @transform_5(%arg0: i32) -> (i32, i32) {
    %c0_i32 = arith.constant 0 : i32
    %c0_i32_0 = arith.constant 0 : i32
    %c0_i32_1 = arith.constant 0 : i32
    return %c0_i32, %c0_i32_0 : i32, i32
  }
  func.func @transform_6(%arg0: i32) -> (i32, i32) {
    %c0_i32 = arith.constant 0 : i32
    %c0_i32_0 = arith.constant 0 : i32
    %c0_i32_1 = arith.constant 0 : i32
    return %c0_i32, %c0_i32_0 : i32, i32
  }
  func.func @transform_7(%arg0: i32) -> (i32, i32) {
    %c0_i32 = arith.constant 0 : i32
    %c0_i32_0 = arith.constant 0 : i32
    return %arg0, %c0_i32 : i32, i32
  }
}

</mosaic_0001>

<bundles_post_ra>
// kernel: decoder_layer.5
= control target key start
LH: loop header
LB: loop body
LE: loop exit
PB: predicated region body
PF: predicated region fallthrough
CT: control target
= control target key end

     0   :  { %12 = vsyncpa [#allocation3], 0  ;;  %s888_s0 = inlined_call_operand.vmem [shape: f32[16,32], index: 0, kind: input, shape index: {}]   ;;  %s889_s1 = inlined_call_operand.vmem [shape: f32[1,32], index: 1, kind: input, shape index: {}]   ;;  %s890_s2 = inlined_call_operand.vmem [shape: f32[1,32], index: 2, kind: input, shape index: {}]   ;;  %s891_s3 = inlined_call_operand.vmem [shape: bf16[32,64], index: 3, kind: input, shape index: {}]   ;;  %s892_s4 = inlined_call_operand.vmem [shape: f32[1,64], index: 4, kind: input, shape index: {}]   ;;  %s893_s5 = inlined_call_operand.vmem [shape: bf16[64,32], index: 5, kind: input, shape index: {}]   ;;  %s894_s6 = inlined_call_operand.vmem [shape: f32[1,32], index: 6, kind: input, shape index: {}]   ;;  %s895_s7 = inlined_call_operand.hbm [shape: f32[16,32], index: 7, kind: output, shape index: {}]  }
   0x1   :  { %14 = vsyncpa [#allocation3 + $0x1], 0  ;;  %s749_s24 = smov 0   ;;  %s751_s25 = smov 0  }
   0x2   :  { %s753_s26 = smov 0   ;;  %s755_s27 = smov 0  }
   0x3 LB: > { %s770_s28 = sadd.s32 4294967295, %s704_s27   ;;  %s541_s29 = sadd.s32 4294967294, %s704_s27   ;;  %s704_s27 = sphi %s755_s27, %s901_s27   ;;  %s700_s26 = sphi %s753_s26, %s900_s26   ;;  %s696_s25 = sphi %s751_s25, %s899_s25   ;;  %s692_s24 = sphi %s749_s24, %s898_s24  }
   0x4   : > { %s774_s30 = sadd.s32 1, %s704_s27   ;;  %s179_s8 = sadd.s32 1, %s700_s26 }
   0x5   : > { %s176_s9 = ssub.s32 %s704_s27, %s774_s30  ;;  %p189_p0 = scmp.ne.s32.totalorder %s700_s26, %s696_s25 }
   0x6   : > { %p177_p1 = scmp.eq.s32.totalorder %s176_s9, 0  ;;  %p190_p2 = scmp.eq.s32.totalorder %s770_s28, 1 }
   0x7   : > { %p195_p3 = scmp.ne.s32.totalorder %s696_s25, %s692_s24  ;;  %p196_p4 = scmp.eq.s32.totalorder %s541_s29, 1 }
   0x8   : > { %s785_s10 = scalar_select %p177_p1, %s700_s26, %s179_s8  }
   0x9   : > { %p787_p5 = por %p190_p2, %p189_p0  ;;  %p791_p6 = por %p196_p4, %p195_p3 }
   0xa   : > { %p544_p7 = scmp.ge.s32.totalorder %s704_s27, 1  ;;  %p239_p8 = scmp.lt.s32.totalorder %s704_s27, 3 }
   0xc   : > { %p240_p9 = pnand %p544_p7, %p239_p8 }
   0xd   : > { %p270_p10 = scmp.lt.s32.totalorder (!%p240_p9), %s770_s28, 1  ;;  %vm278_vm0 = vcmask (!%p240_p9), 261120   ;;  %v632_v7 = vld [vmem:[%s891_s3] sm:$0xff] (!%p240_p9)   ;;  %v706_v8 = vmov (!%p240_p9), 0.0   ;;  %vm707_vm1 = vmmov (!%p240_p9), 0   ;;  %v633_v9 = vld [vmem:[%s891_s3 + $0x8] sm:$0xff] (!%p240_p9)  }
   0xe   : > { %243 = sbr.rel (%p240_p9) target bundleno = 804 (0x324), region = 48  ;;  %571 = vmatprep.subr.bf16.mxu0 (!%p240_p9), %v706_v8  ;;  %575 = vmatprep.mubr.msk.bf16.mxu0 (!%p240_p9), %vm707_vm1, %v706_v8  ;;  %v634_v10 = vld [vmem:[%s893_s5] sm:$0xff] (!%p240_p9)   ;;  %v635_v11 = vld [vmem:[%s893_s5 + $0x8] sm:$0xff] (!%p240_p9)   ;;  %v636_v27 = vld [vmem:[%s893_s5 + $0x10] sm:$0xff] (!%p240_p9)   ;;  %vm422_vm4 = vcmask (!%p240_p9), 523264   ;;  %s267_s22 = sand.u32 (!%p240_p9), 1, %s696_s25  }
   0xf   : > { %572 = vmatpush3.bf16.msra.mxu0 (!%p240_p9), %v632_v7  ;;  %579 = vmatprep.subr.bf16.mxu1 (!%p240_p9), %v706_v8  ;;  %v547_v21 = vld [vmem:[%s889_s1] ss:$0 sm:$0xff] (!%p240_p9)  ;;  %v637_v28 = vld [vmem:[%s893_s5 + $0x18] sm:$0xff] (!%p240_p9)   ;;  %s545_s23 = sshll.u32 (!%p240_p9), %s267_s22, 3  ;;  %s560_s9 = sshll.u32 (!%p240_p9), %s770_s28, 7 }
  0x10   : > { %573 = vmatprep.subr.bf16.mxu0 (!%p240_p9), %v706_v8  ;;  %587 = vmatprep.mubr.msk.bf16.mxu1 (!%p240_p9), %vm707_vm1, %v706_v8  ;;  %v548_v23 = vld [vmem:[%s890_s2] ss:$0 sm:$0xff] (!%p240_p9)  ;;  %s708_s19 = smov (!%p240_p9), [#allocation2]  }
  0x11   : > { %580 = vmatpush3.bf16.msra.mxu1 (!%p240_p9), %v634_v10  ;;  %v549_v29 = vld [vmem:[%s892_s4] ss:$0 sm:$0xff] (!%p240_p9)  ;;  %s646_s20 = sshll.u32 (!%p240_p9), %s708_s19, 4  ;;  %s647_s20 = int_to_ptr.vmem [resolvable:$false] %s646_s20 }
  0x12   : > { %581 = vmatprep.subr.bf16.mxu1 (!%p240_p9), %v706_v8  ;;  %v553_v37 = vld [vmem:[%s894_s6] ss:$0 sm:$0xff] (!%p240_p9)  ;;  %s648_s21 = scalar_lea.vmem (!%p240_p9), %s647_s20, 256 }
  0x13   : > { %574 = vmatpush3.bf16.msra.mxu0 (!%p240_p9), %v633_v9 }
  0x15   : > { %s271_s13 = scalar_select %p270_p10, %s770_s28, 1  ;;  %582 = vmatpush3.bf16.msra.mxu1 %v635_v11 }
  0x16   : > { %583 = vmatprep.subr.bf16.mxu1 %v706_v8  ;;  %s469_s28 = scalar_lea.sflag [#allocation3], %s267_s22 }
  0x17   : > { %s546_s14 = sshll.u32 %s271_s13, 3  ;;  %s269_s13 = scalar_lea.vmem [#allocation2], %s545_s23 }
  0x18   : > { %s273_s17 = scalar_lea.vmem %s888_s0, %s546_s14  ;;  %s482_s14 = sshll.u32 %s269_s13, 4  ;;  %s847_s14 = int_to_ptr.vmem [resolvable:$true] %s482_s14 }
  0x19   : > { %v802_v0 = vld [vmem:[%s273_s17] sm:$0xff]  ;;  %584 = vmatpush3.bf16.msra.mxu1 %v636_v27  ;;  %s845_s17 = scalar_lea.hbm %s895_s7, %s560_s9  ;;  %s642_s18 = scalar_lea.vmem %s847_s14, 128 }
  0x1a   : > { %v279_v1 = vsel %vm278_vm0, %v802_v0, 0.0  ;;  %585 = vmatprep.subr.bf16.mxu1 %v706_v8  ;;  %p643_p11 = scmp.ne.s32.totalorder %s847_s14, %s642_s18  ;;  %p649_p0 = scmp.lt.s32.totalorder %s847_s14, %s647_s20 }
  0x1b   : > { %280 = vadd.xlane.f32.xlu0 %v279_v1  ;;  %p650_p1 = scmp.lt.s32.totalorder %s648_s21, %s642_s18 }
  0x1c   : > { %p644_p12 = pnand %p643_p11, %p787_p5 }
  0x1d   : > { %586 = vmatpush3.bf16.msra.mxu1 %v637_v28  ;;  %p651_p2 = por %p650_p1, %p649_p0 }
  0x1e   : > { %p645_p13 = pneg %p644_p12 }
  0x20   : > { %p652_p3 = pnand %p651_p2, %p645_p13 }
  0xa8   : > { %v281_v2 = vpop.xlane.xlu0 %280 }
  0xa9   : > { %v283_v3 = vmul.f32 0.03125, %v281_v2 }
  0xab   : > { %v284_v4 = vsub.f32 %v802_v0, %v283_v3 }
  0xad   : > { %v285_v5 = vmul.f32 %v284_v4, %v284_v4 }
  0xaf   : > { %v286_v6 = vsel %vm278_vm0, %v285_v5, 0.0 }
  0xb0   : > { %287 = vadd.xlane.f32.xlu0 %v286_v6 }
 0x13d   : > { %v288_v12 = vpop.xlane.xlu0 %287 }
 0x13e   : > { %v289_v13 = vmul.f32 0.032258064, %v288_v12 }
 0x140   : > { %638 = vrsqrt.f32 %v289_v13  ;;  %vm292_vm2 = vcmp.eq.f32.partialorder %v289_v13, inf  ;;  %v295_v16 = vand.u32 2147483648, %v289_v13  ;;  %vm294_vm3 = vcmp.eq.f32.partialorder %v289_v13, 0.0 }
 0x14a   : > { %v639_v14 = vpop.eup %638 }
 0x14b   : > { %v291_v15 = vmul.f32 %v639_v14, %v289_v13 }
 0x14d   : > { %v293_v17 = vsel %vm292_vm2, %v289_v13, %v291_v15 }
 0x14e   : > { %v296_v18 = vsel %vm294_vm3, %v295_v16, %v293_v17 }
 0x14f   : > { %v297_v19 = vadd.f32 1e-06, %v296_v18 }
 0x151   : > { %640 = vrcp.f32 %v297_v19 }
 0x15b   : > { %v641_v20 = vpop.eup %640 }
 0x15c   : > { %v299_v22 = vmul.f32 %v641_v20, %v284_v4 }
 0x15e   : > { %v306_v24 = vmul.f32 %v547_v21, %v299_v22 }
 0x160   : > { %v313_v25 = vadd.f32 %v548_v23, %v306_v24 }
 0x162   : > { %v314_v26 = vpack.c.bf16 %v313_v25, %v313_v25 }
 0x164   : > { %576 = vmatmul.mubr.msk.bf16.vlgmr.msra.gmra.mrb[0].mxu0 %vm278_vm0, %v314_v26 }
 0x237   : > { %v375_v30 = vpop.f32.mrb[0].mxu0 }
 0x238   : > { %v376_v31 = vadd.f32 %v549_v29, %v375_v30  ;;  %v577_v32 = vpop.f32.mrb[1].mxu0 }
 0x239   : > { %v378_v33 = vpop.f32.mrb[2].mxu0 }
 0x23a   : > { %v381_v34 = vmax.f32 %v376_v31, 0.0  ;;  %v578_v35 = vpop.f32.mrb[3].mxu0 }
 0x23c   : > { %v382_v36 = vpack.c.bf16 %v381_v34, %v381_v34 }
 0x23e   : > { %588 = vmatmul.mubr.msk.bf16.vlgmr.msra.gmra.mrb[0].mxu1 %vm422_vm4, %v382_v36 }
 0x311   : > { %v460_v38 = vpop.f32.mrb[0].mxu1 }
 0x312   : > { %v461_v39 = vadd.f32 %v553_v37, %v460_v38  ;;  %v589_v40 = vpop.f32.mrb[1].mxu1 }
 0x313   : > { %v463_v41 = vpop.f32.mrb[2].mxu1 }
 0x314   : > { %v466_v42 = vadd.f32 %v461_v39, %v802_v0  ;;  %v590_v43 = vpop.f32.mrb[3].mxu1 }
 0x316   : > { %467 = vst.msk [vmem:[%s269_s13] sm:$0xff] %vm278_vm0, %v466_v42 }
 0x317   : > { %655 = shalt.err (!%p652_p3)
}
 0x318   : > { %s656_s22 = scalar_lea.hbm %s845_s17, 128  ;;  %s660_s8 = scalar_lea.hbm %s895_s7, 256 }
 0x319   : > { %p657_p4 = scmp.ne.s32.totalorder %s845_s17, %s656_s22  ;;  %p661_p9 = scmp.lt.u32.totalorder %s845_s17, %s895_s7 }
 0x31a   : > { %p662_p10 = scmp.lt.u32.totalorder %s660_s8, %s656_s22  ;;  %p664_p12 = scmp.lt.u32.totalorder %s656_s22, %s845_s17 }
 0x31b   : > { %p658_p7 = pnand %p657_p4, %p787_p5 }
 0x31c   : > { %p663_p11 = por %p662_p10, %p661_p9 }
 0x31d   : > { %p659_p8 = pneg %p658_p7 }
 0x31e   : > { %p665_p13 = por %p664_p12, %p663_p11 }
 0x320   : > { %p666_p0 = pnand %p665_p13, %p659_p8 }
 0x322   : > { %669 = shalt.err (!%p666_p0)
}
 0x323   : > { %591 = dma.vmem_to_hbm [thread:$0]  (%p787_p5), %s847_s14, 128, %s845_s17, %s469_s28  }
 0x324 PF: > { %p597_p1 = scmp.ge.s32.totalorder %s704_s27, 2  ;;  %s494_s15 = sand.u32 1, %s692_s24  }
 0x325   : > { %s495_s16 = scalar_lea.sflag [#allocation3], %s494_s15 }
 0x326   : > { %p594_p2 = pnand %p597_p1, %p791_p6 }
 0x328   : > { %687 = dma.done.wait (!%p594_p2), %s495_s16, 128  }
 0x329   : > { %689 = vsyncadd (!%p594_p2), %s495_s16, 4294967168  ;;  %p17_p3 = scmp.ge.s32.totalorder %s774_s30, 4   ;;  %s898_s24 = smov %s696_s25 }
 0x32a   : > { %s899_s25 = smov %s700_s26  ;;  %s900_s26 = smov %s785_s10 }
 0x32b   : > { %s901_s27 = smov %s774_s30  ;;  %19 = sbr.rel (!%p17_p3) target bundleno = 3 (0x3), region = 83 }
 0x332   :  { %500 = vsyncpa [#allocation3], 1 }
 0x333   :  { %502 = vsyncpa [#allocation3 + $0x1], 1 }

// kernel: decoder_layer.3
= control target key start
LH: loop header
LB: loop body
LE: loop exit
PB: predicated region body
PF: predicated region fallthrough
CT: control target
= control target key end

     0   :  { %s1258_s27 = smov 0   ;;  %s1388_s0 = inlined_call_operand.vmem [shape: f32[2,8,32], index: 0, kind: input, shape index: {}]   ;;  %s1389_s1 = inlined_call_operand.vmem [shape: s32[2,8,8], index: 1, kind: input, shape index: {}]   ;;  %s1390_s2 = inlined_call_operand.vmem [shape: f32[1,32], index: 2, kind: input, shape index: {}]   ;;  %s1391_s3 = inlined_call_operand.vmem [shape: f32[1,32], index: 3, kind: input, shape index: {}]   ;;  %s1392_s4 = inlined_call_operand.vmem [shape: bf16[32,96], index: 4, kind: input, shape index: {}]   ;;  %s1393_s5 = inlined_call_operand.vmem [shape: f32[1,96], index: 5, kind: input, shape index: {}]   ;;  %s1394_s6 = inlined_call_operand.vmem [shape: bf16[32,32], index: 6, kind: input, shape index: {}]   ;;  %s1395_s7 = inlined_call_operand.vmem [shape: f32[1,32], index: 7, kind: input, shape index: {}]   ;;  %s1396_s8 = inlined_call_operand.vmem [shape: f32[2,8,32], index: 8, kind: output, shape index: {}]  }
   0x1 LB: > { %s1027_s28 = sadd.s32 4294967295, %s1195_s27   ;;  %p1031_p0 = scmp.ge.s32.totalorder %s1195_s27, 1  ;;  %s1195_s27 = sphi %s1258_s27, %s18_s27  }
   0x2   : > { %p270_p1 = scmp.lt.s32.totalorder %s1195_s27, 3 }
   0x4   : > { %p271_p2 = pnand %p1031_p0, %p270_p1 }
   0x5   : > { %p306_p3 = scmp.lt.s32.totalorder (!%p271_p2), %s1027_s28, 1  ;;  %vm322_vm0 = vcmask (!%p271_p2), 261120   ;;  %v1165_v7 = vld [vmem:[%s1392_s4] sm:$0xff] (!%p271_p2)   ;;  %v1197_v8 = vmov (!%p271_p2), 0.0   ;;  %vm1198_vm1 = vmmov (!%p271_p2), 0   ;;  %v1166_v9 = vld [vmem:[%s1392_s4 + $0x8] sm:$0xff] (!%p271_p2)  }
   0x6   : > { %274 = sbr.rel (%p271_p2) target bundleno = 1823 (0x71f), region = 52  ;;  %1077 = vmatprep.subr.bf16.mxu0 (!%p271_p2), %v1197_v8  ;;  %1081 = vmatprep.mubr.msk.bf16.mxu0 (!%p271_p2), %vm1198_vm1, %v1197_v8  ;;  %v1035_v19 = vld [vmem:[%s1390_s2] ss:$0 sm:$0xff] (!%p271_p2)  ;;  %s1199_s21 = smov (!%p271_p2), 96   ;;  %vm432_vm4 = vcmask (!%p271_p2), 64512   ;;  %vm498_vm6 = vcmask (!%p271_p2), 1043456  }
   0x7   : > { %1078 = vmatpush3.bf16.msra.mxu0 (!%p271_p2), %v1165_v7  ;;  %1085 = vmatprep.subr.bf16.mxu1 (!%p271_p2), %v1197_v8  ;;  %v1036_v21 = vld [vmem:[%s1391_s3] ss:$0 sm:$0xff] (!%p271_p2)  ;;  %s1200_s22 = smov (!%p271_p2), 120   ;;  %s1201_s23 = smov (!%p271_p2), 88   ;;  %vm889_vm7 = vcmask (!%p271_p2), 130048   ;;  %vm891_vm8 = vcmask (!%p271_p2), 195584  }
   0x8   : > { %1079 = vmatprep.subr.bf16.mxu0 (!%p271_p2), %v1197_v8  ;;  %1087 = vmatprep.mubr.msk.bf16.mxu1 (!%p271_p2), %vm1198_vm1, %v1197_v8  ;;  %v1037_v25 = vld [vmem:[%s1393_s5] ss:$0 sm:$0xff] (!%p271_p2)  ;;  %s1202_s24 = smov (!%p271_p2), 80   ;;  %s1203_s25 = smov (!%p271_p2), 112  }
   0x9   : > { %s1204_s26 = smov (!%p271_p2), 72   ;;  %s1206_s11 = smov (!%p271_p2), 64  }
   0xa   : > { %s1207_s12 = smov (!%p271_p2), 56   ;;  %s1208_s13 = smov (!%p271_p2), 48  }
   0xb   : > { %1080 = vmatpush3.bf16.msra.mxu0 (!%p271_p2), %v1166_v9  ;;  %s1209_s14 = smov (!%p271_p2), 40   ;;  %s1210_s15 = smov (!%p271_p2), 8  }
   0xc   : > { %1091 = vmatprep.subr.bf16.mxu0 (!%p271_p2), %v1197_v8  ;;  %s1211_s20 = smov (!%p271_p2), 16  }
   0xd   : > { %s1398_s28 = smov (!%p306_p3, %s1027_s28), 1 }
   0xe   : > { %s1266_s29 = sshll.u32 %s1398_s28, 3  ;;  %s1205_s28 = smov 104  }
   0xf   : > { %s309_s10 = scalar_lea.vmem %s1388_s0, %s1266_s29 }
  0x10   : > { %v1272_v0 = vld [vmem:[%s309_s10] sm:$0xff]  ;;  %s313_s10 = scalar_lea.vmem %s1389_s1, %s1266_s29 }
  0x11   : > { %v323_v1 = vsel %vm322_vm0, %v1272_v0, 0.0  ;;  %v426_v45 = vld [vmem:[%s313_s10] sm:$0xff] }
  0x12   : > { %324 = vadd.xlane.f32.xlu0 %v323_v1  ;;  %vm479_vm5 = vcmp.eq.s32.totalorder %v426_v45, 0 }
  0x9f   : > { %v325_v2 = vpop.xlane.xlu0 %324 }
  0xa0   : > { %v327_v3 = vmul.f32 0.03125, %v325_v2 }
  0xa2   : > { %v328_v4 = vsub.f32 %v1272_v0, %v327_v3 }
  0xa4   : > { %v329_v5 = vmul.f32 %v328_v4, %v328_v4 }
  0xa6   : > { %v330_v6 = vsel %vm322_vm0, %v329_v5, 0.0 }
  0xa7   : > { %331 = vadd.xlane.f32.xlu0 %v330_v6 }
 0x134   : > { %v332_v10 = vpop.xlane.xlu0 %331 }
 0x135   : > { %v333_v11 = vmul.f32 0.032258064, %v332_v10 }
 0x137   : > { %1169 = vrsqrt.f32 %v333_v11  ;;  %vm336_vm2 = vcmp.eq.f32.partialorder %v333_v11, inf  ;;  %v339_v14 = vand.u32 2147483648, %v333_v11  ;;  %vm338_vm3 = vcmp.eq.f32.partialorder %v333_v11, 0.0 }
 0x141   : > { %v1170_v12 = vpop.eup %1169 }
 0x142   : > { %v335_v13 = vmul.f32 %v1170_v12, %v333_v11 }
 0x144   : > { %v337_v15 = vsel %vm336_vm2, %v333_v11, %v335_v13 }
 0x145   : > { %v340_v16 = vsel %vm338_vm3, %v339_v14, %v337_v15 }
 0x146   : > { %v341_v17 = vadd.f32 1e-06, %v340_v16 }
 0x148   : > { %1171 = vrcp.f32 %v341_v17 }
 0x152   : > { %v1172_v18 = vpop.eup %1171 }
 0x153   : > { %v343_v20 = vmul.f32 %v1172_v18, %v328_v4 }
 0x155   : > { %v350_v22 = vmul.f32 %v1035_v19, %v343_v20 }
 0x157   : > { %v357_v23 = vadd.f32 %v1036_v21, %v350_v22 }
 0x159   : > { %v358_v24 = vpack.c.bf16 %v357_v23, %v357_v23 }
 0x15b   : > { %1082 = vmatmul.mubr.msk.bf16.vlgmr.msra.gmra.mrb[0].mxu0 %vm322_vm0, %v358_v24 }
 0x15c   : > { %1093 = vmatprep.mubr.msk.bf16.mxu0 %vm1198_vm1, %v1197_v8 }
 0x22e   : > { %v419_v26 = vpop.f32.mrb[0].mxu0 }
 0x22f   : > { %v420_v27 = vadd.f32 %v1037_v25, %v419_v26  ;;  %v1083_v28 = vpop.f32.mrb[1].mxu0 }
 0x230   : > { %v422_v29 = vpop.f32.mrb[2].mxu0 }
 0x231   : > { %v425_v30 = vmul.f32 0.35355338, %v420_v27  ;;  %v1304_v31 = vpack.c.bf16 %v420_v27, %v420_v27  ;;  %v1084_v32 = vpop.f32.mrb[3].mxu0 }
 0x233   : > { %v427_v33 = vpack.c.bf16 %v425_v30, %v425_v30  ;;  %430 = vrot.lane.b32.xlu1 %v1304_v31, %s1199_s21  ;;  %s1212_s21 = smov 24  }
 0x235   : > { %543 = vrot.lane.b32.xlu0 %v427_v33, %s1200_s22 }
 0x237   : > { %545 = vrot.lane.b32.xlu1 %v1304_v31, %s1201_s23 }
 0x23b   : > { %656 = vrot.lane.b32.xlu1 %v1304_v31, %s1202_s24 }
 0x23f   : > { %654 = vrot.lane.b32.xlu1 %v427_v33, %s1203_s25 }
 0x243   : > { %767 = vrot.lane.b32.xlu1 %v1304_v31, %s1204_s26  ;;  %s317_s26 = scalar_lea.vmem %s1396_s8, %s1266_s29 }
 0x247   : > { %765 = vrot.lane.b32.xlu1 %v427_v33, %s1205_s28 }
 0x2a5   : > { %v431_v34 = vpop.permute.xlu1 %430 }
 0x2a6   : > { %v437_v35 = vsel %vm432_vm4, %v431_v34, 0 }
 0x2a7   : > { %1086 = vmatpush3.bf16.xpose.msra.mxu1 %v437_v35  ;;  %v544_v39 = vpop.permute.xlu0 %543 }
 0x2a8   : > { %1097 = vmatprep.subr.bf16.mxu1 %v1197_v8 }
 0x2a9   : > { %v546_v36 = vpop.permute.xlu1 %545 }
 0x2aa   : > { %v551_v37 = vsel %vm432_vm4, %v546_v36, 0 }
 0x2ad   : > { %v657_v38 = vpop.permute.xlu1 %656 }
 0x2ae   : > { %1088 = vmatmul.mubr.msk.bf16.vlgmr.msra.gmra.mrb[0].mxu1 %vm432_vm4, %v427_v33  ;;  %v662_v41 = vsel %vm432_vm4, %v657_v38, 0 }
 0x2af   : > { %1098 = vmatpush3.bf16.xpose.msra.mxu1 %v551_v37  ;;  %1099 = vmatprep.mubr.msk.bf16.mxu1 %vm1198_vm1, %v1197_v8 }
 0x2b0   : > { %1109 = vmatprep.subr.bf16.mxu1 %v1197_v8 }
 0x2b1   : > { %v655_v40 = vpop.permute.xlu1 %654 }
 0x2b5   : > { %v768_v42 = vpop.permute.xlu1 %767 }
 0x2b6   : > { %1100 = vmatmul.mubr.msk.bf16.vlgmr.msra.gmra.mrb[4].mxu1 %vm432_vm4, %v544_v39  ;;  %v773_v43 = vsel %vm432_vm4, %v768_v42, 0 }
 0x2b7   : > { %1110 = vmatpush3.bf16.xpose.msra.mxu1 %v662_v41  ;;  %1111 = vmatprep.mubr.msk.bf16.mxu1 %vm1198_vm1, %v1197_v8 }
 0x2b8   : > { %1121 = vmatprep.subr.bf16.mxu1 %v1197_v8 }
 0x2b9   : > { %v766_v44 = vpop.permute.xlu1 %765 }
 0x2be   : > { %1112 = vmatmul.mubr.msk.bf16.vlgmr.msra.gmra.mrb[8].mxu1 %vm432_vm4, %v655_v40 }
 0x2bf   : > { %1122 = vmatpush3.bf16.xpose.msra.mxu1 %v773_v43  ;;  %1123 = vmatprep.mubr.msk.bf16.mxu1 %vm1198_vm1, %v1197_v8 }
 0x2c0   : > { %1133 = vmatprep.subr.bf16.mxu1 %v1197_v8 }
 0x2c6   : > { %1124 = vmatmul.mubr.msk.bf16.vlgmr.msra.gmra.mrb[12].mxu1 %vm432_vm4, %v766_v44 }
 0x2c7   : > { %1137 = vmatprep.mubr.msk.bf16.mxu1 %vm1198_vm1, %v1197_v8 }
 0x381   : > { %v473_v46 = vpop.f32.mrb[0].mxu1 }
 0x382   : > { %v480_v47 = vsel %vm479_vm5, -1e+09, %v473_v46  ;;  %v1089_v48 = vpop.f32.mrb[1].mxu1 }
 0x383   : > { %v476_v49 = vpop.f32.mrb[2].mxu1  ;;  %v481_v50 = vsel %vm432_vm4, %v480_v47, -inf }
 0x384   : > { %482 = vmax.xlane.f32.xlu1 %v481_v50  ;;  %v1090_v51 = vpop.f32.mrb[3].mxu1 }
 0x389   : > { %v587_v52 = vpop.f32.mrb[4].mxu1 }
 0x38a   : > { %v593_v53 = vsel %vm479_vm5, -1e+09, %v587_v52  ;;  %v1101_v54 = vpop.f32.mrb[5].mxu1 }
 0x38b   : > { %v590_v55 = vpop.f32.mrb[6].mxu1  ;;  %v594_v56 = vsel %vm432_vm4, %v593_v53, -inf }
 0x38c   : > { %595 = vmax.xlane.f32.xlu0 %v594_v56  ;;  %v1102_v57 = vpop.f32.mrb[7].mxu1 }
 0x391   : > { %v698_v58 = vpop.f32.mrb[8].mxu1 }
 0x392   : > { %v704_v59 = vsel %vm479_vm5, -1e+09, %v698_v58  ;;  %v1113_v60 = vpop.f32.mrb[9].mxu1 }
 0x393   : > { %v701_v61 = vpop.f32.mrb[10].mxu1  ;;  %v705_v62 = vsel %vm432_vm4, %v704_v59, -inf  ;;  %v1167_v60 = vld [vmem:[%s1394_s6] sm:$0xff]  }
 0x394   : > { %706 = vmax.xlane.f32.xlu1 %v705_v62  ;;  %v1114_v63 = vpop.f32.mrb[11].mxu1  ;;  %1134 = vmatpush3.bf16.msra.mxu1 %v1167_v60  ;;  %v1168_v61 = vld [vmem:[%s1394_s6 + $0x8] sm:$0xff]  }
 0x395   : > { %1135 = vmatprep.subr.bf16.mxu1 %v1197_v8 }
 0x398   : > { %1136 = vmatpush3.bf16.msra.mxu1 %v1168_v61 }
 0x399   : > { %v809_v1 = vpop.f32.mrb[12].mxu1 }
 0x39a   : > { %v815_v2 = vsel %vm479_vm5, -1e+09, %v809_v1  ;;  %v1125_v3 = vpop.f32.mrb[13].mxu1 }
 0x39b   : > { %v812_v4 = vpop.f32.mrb[14].mxu1  ;;  %v816_v5 = vsel %vm432_vm4, %v815_v2, -inf }
 0x39c   : > { %817 = vmax.xlane.f32.xlu0 %v816_v5  ;;  %v1126_v6 = vpop.f32.mrb[15].mxu1 }
 0x411   : > { %v483_v7 = vpop.xlane.xlu1 %482 }
 0x412   : > { %v484_v9 = vsub.f32 %v480_v47, %v483_v7 }
 0x414   : > { %v485_v10 = vmul.f32 1.442695, %v484_v9 }
 0x416   : > { %1173 = vpow2.f32 %v485_v10 }
 0x419   : > { %v596_v11 = vpop.xlane.xlu0 %595 }
 0x41a   : > { %v597_v12 = vsub.f32 %v593_v53, %v596_v11 }
 0x41c   : > { %v598_v13 = vmul.f32 1.442695, %v597_v12 }
 0x41e   : > { %1175 = vpow2.f32 %v598_v13 }
 0x420   : > { %v1174_v14 = vpop.eup %1173 }
 0x421   : > { %v487_v15 = vsel %vm432_vm4, %v1174_v14, 0.0  ;;  %v707_v23 = vpop.xlane.xlu1 %706 }
 0x422   : > { %488 = vadd.xlane.f32.xlu1 %v487_v15  ;;  %v708_v24 = vsub.f32 %v704_v59, %v707_v23 }
 0x424   : > { %v709_v25 = vmul.f32 1.442695, %v708_v24 }
 0x428   : > { %v1176_v16 = vpop.eup %1175 }
 0x429   : > { %v818_v17 = vpop.xlane.xlu0 %817  ;;  %v600_v18 = vsel %vm432_vm4, %v1176_v16, 0.0 }
 0x42a   : > { %v819_v19 = vsub.f32 %v815_v2, %v818_v17  ;;  %601 = vadd.xlane.f32.xlu0 %v600_v18 }
 0x42c   : > { %v820_v20 = vmul.f32 1.442695, %v819_v19 }
 0x42e   : > { %1177 = vpow2.f32 %v820_v20 }
 0x42f   : > { %1179 = vpow2.f32 %v709_v25 }
 0x433   : > { %493 = vrot.lane.b32.xlu1 %v1304_v31, %s1206_s11 }
 0x438   : > { %v1178_v21 = vpop.eup %1177 }
 0x439   : > { %v822_v22 = vsel %vm432_vm4, %v1178_v21, 0.0  ;;  %v1180_v26 = vpop.eup %1179 }
 0x43a   : > { %823 = vadd.xlane.f32.xlu0 %v822_v22  ;;  %v711_v27 = vsel %vm432_vm4, %v1180_v26, 0.0 }
 0x450   : > { %606 = vrot.lane.b32.xlu0 %v1304_v31, %s1207_s12 }
 0x457   : > { %712 = vadd.xlane.f32.xlu1 %v711_v27 }
 0x468   : > { %717 = vrot.lane.b32.xlu1 %v1304_v31, %s1208_s13 }
 0x46c   : > { %828 = vrot.lane.b32.xlu1 %v1304_v31, %s1209_s14 }
 0x4af   : > { %v489_v28 = vpop.xlane.xlu1 %488 }
 0x4b0   : > { %1181 = vrcp.f32 %v489_v28 }
 0x4b3   : > { %v494_v29 = vpop.permute.xlu1 %493 }
 0x4b4   : > { %v500_v30 = vsel %vm498_vm6, %v494_v29, 0 }
 0x4b5   : > { %1092 = vmatpush3.bf16.msra.mxu0 %v500_v30 }
 0x4b6   : > { %1103 = vmatprep.subr.bf16.mxu0 %v1197_v8 }
 0x4b7   : > { %v602_v33 = vpop.xlane.xlu0 %601 }
 0x4b8   : > { %1183 = vrcp.f32 %v602_v33 }
 0x4ba   : > { %v1182_v32 = vpop.eup %1181 }
 0x4bb   : > { %v491_v34 = vmul.f32 %v1182_v32, %v1174_v14  ;;  %v1049_v14 = vld [vmem:[%s1395_s7] ss:$0 sm:$0xff] }
 0x4bd   : > { %v492_v35 = vpack.c.bf16 %v491_v34, %v491_v34 }
 0x4bf   : > { %1094 = vmatmul.mubr.msk.bf16.vlgmr.msra.gmra.mrb[4].mxu0 %vm432_vm4, %v492_v35 }
 0x4c0   : > { %1105 = vmatprep.mubr.msk.bf16.mxu0 %vm1198_vm1, %v1197_v8 }
 0x4c2   : > { %v1184_v31 = vpop.eup %1183 }
 0x4c3   : > { %v604_v37 = vmul.f32 %v1184_v31, %v1176_v16 }
 0x4c5   : > { %v605_v40 = vpack.c.bf16 %v604_v37, %v604_v37 }
 0x4c7   : > { %v824_v36 = vpop.xlane.xlu0 %823 }
 0x4cb   : > { %v607_v38 = vpop.permute.xlu0 %606 }
 0x4cc   : > { %v612_v39 = vsel %vm498_vm6, %v607_v38, 0 }
 0x4cd   : > { %1104 = vmatpush3.bf16.msra.mxu0 %v612_v39 }
 0x4ce   : > { %1115 = vmatprep.subr.bf16.mxu0 %v1197_v8 }
 0x4d0   : > { %1106 = vmatmul.mubr.msk.bf16.vlgmr.msra.gmra.mrb[8].mxu0 %vm432_vm4, %v605_v40 }
 0x4d1   : > { %1117 = vmatprep.mubr.msk.bf16.mxu0 %vm1198_vm1, %v1197_v8 }
 0x4e4   : > { %v713_v41 = vpop.xlane.xlu1 %712 }
 0x4e5   : > { %1185 = vrcp.f32 %v713_v41 }
 0x4e6   : > { %1187 = vrcp.f32 %v824_v36 }
 0x4e8   : > { %v718_v42 = vpop.permute.xlu1 %717 }
 0x4e9   : > { %v723_v43 = vsel %vm498_vm6, %v718_v42, 0 }
 0x4ea   : > { %1116 = vmatpush3.bf16.msra.mxu0 %v723_v43 }
 0x4eb   : > { %1127 = vmatprep.subr.bf16.mxu0 %v1197_v8 }
 0x4ec   : > { %v829_v46 = vpop.permute.xlu1 %828 }
 0x4ed   : > { %v834_v49 = vsel %vm498_vm6, %v829_v46, 0 }
 0x4ef   : > { %v1186_v44 = vpop.eup %1185 }
 0x4f0   : > { %v715_v45 = vmul.f32 %v1186_v44, %v1180_v26  ;;  %v1188_v48 = vpop.eup %1187 }
 0x4f1   : > { %v826_v50 = vmul.f32 %v1188_v48, %v1178_v21 }
 0x4f2   : > { %v716_v47 = vpack.c.bf16 %v715_v45, %v715_v45 }
 0x4f3   : > { %v827_v51 = vpack.c.bf16 %v826_v50, %v826_v50 }
 0x4f4   : > { %1118 = vmatmul.mubr.msk.bf16.vlgmr.msra.gmra.mrb[12].mxu0 %vm432_vm4, %v716_v47 }
 0x4f5   : > { %1128 = vmatpush3.bf16.msra.mxu0 %v834_v49  ;;  %1129 = vmatprep.mubr.msk.bf16.mxu0 %vm1198_vm1, %v1197_v8 }
 0x4fc   : > { %1130 = vmatmul.mubr.msk.bf16.vlgmr.msra.gmra.mrb[16].mxu0 %vm432_vm4, %v827_v51 }
 0x592   : > { %v536_v52 = vpop.f32.mrb[4].mxu0 }
 0x593   : > { %v1095_v53 = vpop.f32.mrb[5].mxu0 }
 0x594   : > { %v539_v54 = vpop.f32.mrb[6].mxu0 }
 0x595   : > { %v1096_v55 = vpop.f32.mrb[7].mxu0 }
 0x5a3   : > { %v648_v56 = vpop.f32.mrb[8].mxu0 }
 0x5a4   : > { %877 = vrot.lane.b32.xlu0 %v648_v56, %s1210_s15  ;;  %v1107_v57 = vpop.f32.mrb[9].mxu0 }
 0x5a5   : > { %v651_v58 = vpop.f32.mrb[10].mxu0 }
 0x5a6   : > { %v1108_v59 = vpop.f32.mrb[11].mxu0 }
 0x5c7   : > { %v759_v62 = vpop.f32.mrb[12].mxu0 }
 0x5c8   : > { %881 = vrot.lane.b32.xlu1 %v759_v62, %s1211_s20  ;;  %v1119_v63 = vpop.f32.mrb[13].mxu0 }
 0x5c9   : > { %v762_v1 = vpop.f32.mrb[14].mxu0 }
 0x5ca   : > { %v1120_v2 = vpop.f32.mrb[15].mxu0 }
 0x5cf   : > { %v870_v3 = vpop.f32.mrb[16].mxu0 }
 0x5d0   : > { %885 = vrot.lane.b32.xlu0 %v870_v3, %s1212_s21  ;;  %v1131_v4 = vpop.f32.mrb[17].mxu0 }
 0x5d1   : > { %v873_v5 = vpop.f32.mrb[18].mxu0 }
 0x5d2   : > { %v1132_v6 = vpop.f32.mrb[19].mxu0 }
 0x616   : > { %v878_v7 = vpop.permute.xlu0 %877 }
 0x617   : > { %v888_v8 = vsel %vm432_vm4, %v536_v52, %v878_v7 }
 0x63a   : > { %v882_v9 = vpop.permute.xlu1 %881 }
 0x63b   : > { %v890_v10 = vsel %vm889_vm7, %v888_v8, %v882_v9 }
 0x642   : > { %v886_v11 = vpop.permute.xlu0 %885 }
 0x643   : > { %v892_v12 = vsel %vm891_vm8, %v890_v10, %v886_v11 }
 0x644   : > { %v893_v13 = vpack.c.bf16 %v892_v12, %v892_v12 }
 0x646   : > { %1138 = vmatmul.mubr.msk.bf16.vlgmr.msra.gmra.mrb[16].mxu1 %vm322_vm0, %v893_v13 }
 0x719   : > { %v954_v15 = vpop.f32.mrb[16].mxu1 }
 0x71a   : > { %v955_v16 = vadd.f32 %v1049_v14, %v954_v15  ;;  %v1139_v17 = vpop.f32.mrb[17].mxu1 }
 0x71b   : > { %v957_v18 = vpop.f32.mrb[18].mxu1 }
 0x71c   : > { %v960_v19 = vadd.f32 %v955_v16, %v1272_v0  ;;  %v1140_v20 = vpop.f32.mrb[19].mxu1 }
 0x71e   : > { %961 = vst.msk [vmem:[%s317_s26] sm:$0xff] %vm322_vm0, %v960_v19 }
 0x71f PF: > { %s18_s27 = sadd.s32 1, %s1195_s27  }
 0x720   : > { %p15_p4 = scmp.ge.s32.totalorder %s18_s27, 4  }
 0x722   :  { %17 = sbr.rel (!%p15_p4) target bundleno = 1 (0x1), region = 85 }

// kernel: decoder_layer.4
= control target key start
LH: loop header
LB: loop body
LE: loop exit
PB: predicated region body
PF: predicated region fallthrough
CT: control target
= control target key end

     0   :  { %s1468_s17 = smov 0   ;;  %s1619_s0 = inlined_call_operand.vmem [shape: f32[2,8,32], index: 0, kind: input, shape index: {}]   ;;  %s1620_s1 = inlined_call_operand.vmem [shape: f32[2,10,32], index: 1, kind: input, shape index: {}]   ;;  %s1621_s2 = inlined_call_operand.vmem [shape: s32[2,1,10], index: 2, kind: input, shape index: {}]   ;;  %s1622_s3 = inlined_call_operand.vmem [shape: f32[1,32], index: 3, kind: input, shape index: {}]   ;;  %s1623_s4 = inlined_call_operand.vmem [shape: f32[1,32], index: 4, kind: input, shape index: {}]   ;;  %s1624_s5 = inlined_call_operand.vmem [shape: bf16[32,32], index: 5, kind: input, shape index: {}]   ;;  %s1625_s6 = inlined_call_operand.vmem [shape: f32[1,32], index: 6, kind: input, shape index: {}]   ;;  %s1626_s7 = inlined_call_operand.vmem [shape: bf16[32,64], index: 7, kind: input, shape index: {}]   ;;  %s1627_s8 = inlined_call_operand.vmem [shape: f32[1,64], index: 8, kind: input, shape index: {}]   ;;  %s1628_s9 = inlined_call_operand.vmem [shape: bf16[32,32], index: 9, kind: input, shape index: {}]   ;;  %s1629_s10 = inlined_call_operand.vmem [shape: f32[1,32], index: 10, kind: input, shape index: {}]   ;;  %s1630_s11 = inlined_call_operand.vmem [shape: f32[2,8,32], index: 11, kind: output, shape index: {}]  }
   0x1 LB: > { %s1209_s18 = sadd.s32 4294967295, %s1393_s17   ;;  %p1213_p0 = scmp.ge.s32.totalorder %s1393_s17, 1  ;;  %s1393_s17 = sphi %s1468_s17, %s21_s17  }
   0x2   : > { %p354_p1 = scmp.lt.s32.totalorder %s1393_s17, 3 }
   0x4   : > { %p355_p2 = pnand %p1213_p0, %p354_p1 }
   0x5   : > { %p400_p3 = scmp.lt.s32.totalorder (!%p355_p2), %s1209_s18, 1  ;;  %vm420_vm0 = vcmask (!%p355_p2), 261120   ;;  %v1361_v7 = vld [vmem:[%s1626_s7] sm:$0xff] (!%p355_p2)   ;;  %v1395_v8 = vmov (!%p355_p2), 0.0   ;;  %v1362_v10 = vld [vmem:[%s1626_s7 + $0x8] sm:$0xff] (!%p355_p2)   ;;  %vm1396_vm1 = vmmov (!%p355_p2), 0   ;;  %v646_v56 = vlaneseq (!%p355_p2) }
   0x6   : > { %358 = sbr.rel (%p355_p2) target bundleno = 1810 (0x712), region = 64  ;;  %1276 = vmatprep.subr.bf16.mxu1 (!%p355_p2), %v1395_v8  ;;  %1268 = vmatprep.subr.bf16.mxu0 (!%p355_p2), %v1395_v8  ;;  %v1363_v9 = vld [vmem:[%s1624_s5] sm:$0xff] (!%p355_p2)   ;;  %v1364_v13 = vld [vmem:[%s1624_s5 + $0x8] sm:$0xff] (!%p355_p2)   ;;  %vm597_vm4 = vcmask (!%p355_p2), 64512   ;;  %s1398_s26 = smov (!%p355_p2), 112   ;;  %v1400_v60 = vmov (!%p355_p2), 0  }
   0x7   : > { %1277 = vmatpush3.bf16.msra.mxu1 (!%p355_p2), %v1361_v7  ;;  %1280 = vmatprep.mubr.msk.bf16.mxu1 (!%p355_p2), %vm1396_vm1, %v1395_v8  ;;  %v1218_v24 = vld [vmem:[%s1622_s3] ss:$0 sm:$0xff] (!%p355_p2)  ;;  %s1399_s29 = smov (!%p355_p2), 104   ;;  %v647_v58 = vshrl.u32 (!%p355_p2), %v646_v56, 7  ;;  %vm652_vm7 = vcmask (!%p355_p2), 80896   ;;  %s1401_s14 = smov (!%p355_p2), 88  }
   0x8   : > { %1278 = vmatprep.subr.bf16.mxu1 (!%p355_p2), %v1395_v8  ;;  %1269 = vmatpush3.bf16.msra.mxu0 (!%p355_p2), %v1363_v9  ;;  %v1219_v26 = vld [vmem:[%s1623_s4] ss:$0 sm:$0xff] (!%p355_p2)  ;;  %s1402_s15 = smov (!%p355_p2), 96   ;;  %s1403_s16 = smov (!%p355_p2), 72   ;;  %vm671_vm8 = vcmask (!%p355_p2), 1044480   ;;  %vm1062_vm9 = vcmask (!%p355_p2), 130048  }
   0x9   : > { %1270 = vmatprep.subr.bf16.mxu0 (!%p355_p2), %v1395_v8  ;;  %1272 = vmatprep.mubr.msk.bf16.mxu0 (!%p355_p2), %vm1396_vm1, %v1395_v8  ;;  %v1224_v30 = vld [vmem:[%s1627_s8] ss:$0 sm:$0xff] (!%p355_p2)  ;;  %v648_v59 = vsub.s32 (!%p355_p2), 0, %v647_v58  ;;  %s1404_s20 = smov (!%p355_p2), 80   ;;  %s1405_s21 = smov (!%p355_p2), 8   ;;  %vm1064_vm10 = vcmask (!%p355_p2), 195584  }
   0xa   : > { %v1220_v39 = vld [vmem:[%s1625_s6] ss:$0 sm:$0xff] (!%p355_p2)  ;;  %s1407_s27 = smov (!%p355_p2), 24  }
   0xb   : > { %1279 = vmatpush3.bf16.msra.mxu1 (!%p355_p2), %v1362_v10 }
   0xc   : > { %1271 = vmatpush3.bf16.msra.mxu0 (!%p355_p2), %v1364_v13  ;;  %1290 = vmatprep.subr.bf16.mxu1 (!%p355_p2), %v1395_v8 }
   0xd   : > { %s1632_s18 = smov (!%p400_p3, %s1209_s18), 1  ;;  %1284 = vmatprep.subr.bf16.mxu0 %v1395_v8 }
   0xe   : > { %s1214_s19 = sshll.u32 %s1632_s18, 3  ;;  %s1242_s25 = sshll.u32 %s1632_s18, 4 }
   0xf   : > { %s403_s22 = scalar_lea.vmem %s1619_s0, %s1214_s19  ;;  %s408_s13 = scalar_lea.vmem %s1620_s1, %s1242_s25 }
  0x10   : > { %v1484_v0 = vld [vmem:[%s403_s22] sm:$0xff]  ;;  %v457_v12 = vld [vmem:[%s408_s13 + $0x8] sm:$0x3]  ;;  %s1397_s25 = smov 120  }
  0x11   : > { %v421_v1 = vsel %vm420_vm0, %v1484_v0, 0.0  ;;  %v456_v11 = vld [vmem:[%s408_s13] sm:$0xff]  ;;  %s411_s13 = scalar_lea.vmem %s1621_s2, %s1632_s18 }
  0x12   : > { %422 = vadd.xlane.f32.xlu0 %v421_v1  ;;  %v458_v14 = vpack.c.bf16 %v457_v12, %v456_v11  ;;  %v594_v57 = vld [vmem:[%s411_s13] sm:$0x1]  ;;  %s415_s13 = scalar_lea.vmem %s1630_s11, %s1214_s19 }
  0x13   : > { %vm644_vm5 = vcmp.eq.s32.totalorder %v594_v57, 0 }
  0x14   : > { %1281 = vmatmul.mubr.msk.bf16.vlgmr.msra.gmra.mrb[0].mxu1 %vm420_vm0, %v458_v14  ;;  %v645_v61 = vsel %vm644_vm5, 1, %v1400_v60 }
  0x15   : > { %1292 = vmatprep.mubr.msk.bf16.mxu1 %vm1396_vm1, %v1395_v8  ;;  %v649_v62 = vrot.slane %v645_v61, %v648_v59 }
  0x17   : > { %vm650_vm6 = vcmp.eq.s32.totalorder %v649_v62, 1 }
  0x9f   : > { %v423_v2 = vpop.xlane.xlu0 %422 }
  0xa0   : > { %v425_v3 = vmul.f32 0.03125, %v423_v2 }
  0xa2   : > { %v426_v4 = vsub.f32 %v1484_v0, %v425_v3 }
  0xa4   : > { %v427_v5 = vmul.f32 %v426_v4, %v426_v4 }
  0xa6   : > { %v428_v6 = vsel %vm420_vm0, %v427_v5, 0.0 }
  0xa7   : > { %429 = vadd.xlane.f32.xlu0 %v428_v6 }
  0xe7   : > { %v587_v31 = vpop.f32.mrb[0].mxu1 }
  0xe8   : > { %v588_v32 = vadd.f32 %v1224_v30, %v587_v31  ;;  %v1282_v33 = vpop.f32.mrb[1].mxu1 }
  0xe9   : > { %v590_v34 = vpop.f32.mrb[2].mxu1 }
  0xea   : > { %v591_v35 = vadd.f32 %v1224_v30, %v590_v34  ;;  %v1283_v36 = vpop.f32.mrb[3].mxu1 }
  0xec   : > { %v1531_v37 = vpack.c.bf16 %v591_v35, %v588_v32 }
  0xee   : > { %718 = vrot.lane.b32.xlu1 %v1531_v37, %s1397_s25  ;;  %829 = vrot.lane.b32.xlu0 %v1531_v37, %s1398_s26  ;;  %v602_v38 = vsel %vm597_vm4, %v1531_v37, 0 }
 0x134   : > { %v430_v15 = vpop.xlane.xlu0 %429 }
 0x135   : > { %v431_v16 = vmul.f32 0.032258064, %v430_v15 }
 0x137   : > { %1367 = vrsqrt.f32 %v431_v16  ;;  %vm434_vm2 = vcmp.eq.f32.partialorder %v431_v16, inf  ;;  %v437_v19 = vand.u32 2147483648, %v431_v16  ;;  %vm436_vm3 = vcmp.eq.f32.partialorder %v431_v16, 0.0 }
 0x141   : > { %v1368_v17 = vpop.eup %1367 }
 0x142   : > { %v433_v18 = vmul.f32 %v1368_v17, %v431_v16 }
 0x144   : > { %v435_v20 = vsel %vm434_vm2, %v431_v16, %v433_v18 }
 0x145   : > { %v438_v21 = vsel %vm436_vm3, %v437_v19, %v435_v20 }
 0x146   : > { %v439_v22 = vadd.f32 1e-06, %v438_v21 }
 0x148   : > { %1369 = vrcp.f32 %v439_v22 }
 0x152   : > { %v1370_v23 = vpop.eup %1369 }
 0x153   : > { %v441_v25 = vmul.f32 %v1370_v23, %v426_v4 }
 0x155   : > { %v448_v27 = vmul.f32 %v1218_v24, %v441_v25 }
 0x157   : > { %v455_v28 = vadd.f32 %v1219_v26, %v448_v27 }
 0x159   : > { %v459_v29 = vpack.c.bf16 %v455_v28, %v455_v28 }
 0x15b   : > { %1273 = vmatmul.mubr.msk.bf16.vlgmr.msra.gmra.mrb[0].mxu0 %vm420_vm0, %v459_v29 }
 0x15c   : > { %1286 = vmatprep.mubr.msk.bf16.mxu0 %vm1396_vm1, %v1395_v8  ;;  %1285 = vmatpush3.bf16.xpose.msra.mxu0 %v602_v38 }
 0x15d   : > { %1296 = vmatprep.subr.bf16.mxu0 %v1395_v8 }
 0x160   : > { %v719_v44 = vpop.permute.xlu1 %718  ;;  %v830_v49 = vpop.permute.xlu0 %829 }
 0x161   : > { %v724_v48 = vsel %vm597_vm4, %v719_v44, 0  ;;  %v835_v51 = vsel %vm597_vm4, %v830_v49, 0 }
 0x22e   : > { %v520_v40 = vpop.f32.mrb[0].mxu0 }
 0x22f   : > { %v521_v41 = vadd.f32 %v1220_v39, %v520_v40  ;;  %v1274_v42 = vpop.f32.mrb[1].mxu0 }
 0x230   : > { %v523_v43 = vpop.f32.mrb[2].mxu0 }
 0x231   : > { %v526_v45 = vmul.f32 0.35355338, %v521_v41  ;;  %v1275_v46 = vpop.f32.mrb[3].mxu0 }
 0x233   : > { %v595_v47 = vpack.c.bf16 %v526_v45, %v526_v45 }
 0x235   : > { %716 = vrot.lane.b32.xlu1 %v595_v47, %s1397_s25  ;;  %1287 = vmatmul.mubr.msk.bf16.vlgmr.msra.gmra.mrb[4].mxu0 %vm597_vm4, %v595_v47 }
 0x236   : > { %1297 = vmatpush3.bf16.xpose.msra.mxu0 %v724_v48  ;;  %1298 = vmatprep.mubr.msk.bf16.mxu0 %vm1396_vm1, %v1395_v8 }
 0x237   : > { %1308 = vmatprep.subr.bf16.mxu0 %v1395_v8 }
 0x239   : > { %827 = vrot.lane.b32.xlu1 %v595_v47, %s1398_s26  ;;  %s1406_s26 = smov 16  }
 0x23d   : > { %940 = vrot.lane.b32.xlu1 %v1531_v37, %s1399_s29 }
 0x241   : > { %938 = vrot.lane.b32.xlu1 %v595_v47, %s1399_s29 }
 0x2a7   : > { %v717_v50 = vpop.permute.xlu1 %716 }
 0x2a8   : > { %1299 = vmatmul.mubr.msk.bf16.vlgmr.msra.gmra.mrb[8].mxu0 %vm597_vm4, %v717_v50 }
 0x2a9   : > { %1309 = vmatpush3.bf16.xpose.msra.mxu0 %v835_v51  ;;  %1310 = vmatprep.mubr.msk.bf16.mxu0 %vm1396_vm1, %v1395_v8 }
 0x2aa   : > { %1320 = vmatprep.subr.bf16.mxu0 %v1395_v8 }
 0x2ab   : > { %v828_v52 = vpop.permute.xlu1 %827 }
 0x2af   : > { %v941_v53 = vpop.permute.xlu1 %940 }
 0x2b0   : > { %v946_v54 = vsel %vm597_vm4, %v941_v53, 0  ;;  %1311 = vmatmul.mubr.msk.bf16.vlgmr.msra.gmra.mrb[12].mxu0 %vm597_vm4, %v828_v52 }
 0x2b1   : > { %1321 = vmatpush3.bf16.xpose.msra.mxu0 %v946_v54  ;;  %1322 = vmatprep.mubr.msk.bf16.mxu0 %vm1396_vm1, %v1395_v8 }
 0x2b2   : > { %1332 = vmatprep.subr.bf16.mxu0 %v1395_v8 }
 0x2b3   : > { %v939_v55 = vpop.permute.xlu1 %938 }
 0x2b8   : > { %1323 = vmatmul.mubr.msk.bf16.vlgmr.msra.gmra.mrb[16].mxu0 %vm597_vm4, %v939_v55 }
 0x2b9   : > { %1336 = vmatprep.mubr.msk.bf16.mxu0 %vm1396_vm1, %v1395_v8 }
 0x308   : > { %v638_v63 = vpop.f32.mrb[4].mxu0 }
 0x309   : > { %v651_v1 = vsel %vm650_vm6, -1e+09, %v638_v63  ;;  %v1288_v2 = vpop.f32.mrb[5].mxu0 }
 0x30a   : > { %v641_v3 = vpop.f32.mrb[6].mxu0  ;;  %v653_v4 = vsel %vm652_vm7, %v651_v1, -inf }
 0x30b   : > { %654 = vmax.xlane.f32.xlu1 %v653_v4  ;;  %v1289_v5 = vpop.f32.mrb[7].mxu0 }
 0x37b   : > { %v760_v6 = vpop.f32.mrb[8].mxu0 }
 0x37c   : > { %v766_v7 = vsel %vm650_vm6, -1e+09, %v760_v6  ;;  %v1300_v9 = vpop.f32.mrb[9].mxu0 }
 0x37d   : > { %v763_v10 = vpop.f32.mrb[10].mxu0  ;;  %v767_v11 = vsel %vm652_vm7, %v766_v7, -inf }
 0x37e   : > { %768 = vmax.xlane.f32.xlu0 %v767_v11  ;;  %v1301_v12 = vpop.f32.mrb[11].mxu0 }
 0x383   : > { %v871_v13 = vpop.f32.mrb[12].mxu0 }
 0x384   : > { %v877_v14 = vsel %vm650_vm6, -1e+09, %v871_v13  ;;  %v1312_v15 = vpop.f32.mrb[13].mxu0 }
 0x385   : > { %v874_v16 = vpop.f32.mrb[14].mxu0  ;;  %v878_v17 = vsel %vm652_vm7, %v877_v14, -inf  ;;  %v1365_v15 = vld [vmem:[%s1628_s9] sm:$0xff]  }
 0x386   : > { %879 = vmax.xlane.f32.xlu1 %v878_v17  ;;  %v1313_v18 = vpop.f32.mrb[15].mxu0  ;;  %1333 = vmatpush3.bf16.msra.mxu0 %v1365_v15  ;;  %v1366_v16 = vld [vmem:[%s1628_s9 + $0x8] sm:$0xff]  }
 0x387   : > { %1334 = vmatprep.subr.bf16.mxu0 %v1395_v8 }
 0x38a   : > { %1335 = vmatpush3.bf16.msra.mxu0 %v1366_v16 }
 0x38b   : > { %v982_v19 = vpop.f32.mrb[16].mxu0 }
 0x38c   : > { %v988_v20 = vsel %vm650_vm6, -1e+09, %v982_v19  ;;  %v1324_v21 = vpop.f32.mrb[17].mxu0 }
 0x38d   : > { %v985_v22 = vpop.f32.mrb[18].mxu0  ;;  %v989_v23 = vsel %vm652_vm7, %v988_v20, -inf }
 0x38e   : > { %990 = vmax.xlane.f32.xlu1 %v989_v23  ;;  %v1325_v24 = vpop.f32.mrb[19].mxu0 }
 0x398   : > { %v655_v25 = vpop.xlane.xlu1 %654 }
 0x399   : > { %v656_v26 = vsub.f32 %v651_v1, %v655_v25 }
 0x39b   : > { %v657_v27 = vmul.f32 1.442695, %v656_v26 }
 0x39d   : > { %1371 = vpow2.f32 %v657_v27 }
 0x3a7   : > { %v1372_v28 = vpop.eup %1371 }
 0x3a8   : > { %v659_v29 = vsel %vm652_vm7, %v1372_v28, 0.0 }
 0x3a9   : > { %660 = vadd.xlane.f32.xlu0 %v659_v29 }
 0x40b   : > { %v769_v30 = vpop.xlane.xlu0 %768 }
 0x40c   : > { %v770_v31 = vsub.f32 %v766_v7, %v769_v30 }
 0x40e   : > { %v771_v32 = vmul.f32 1.442695, %v770_v31  ;;  %v1236_v31 = vld [vmem:[%s1629_s10] ss:$0 sm:$0xff] }
 0x410   : > { %1373 = vpow2.f32 %v771_v32 }
 0x413   : > { %v880_v33 = vpop.xlane.xlu1 %879 }
 0x414   : > { %v881_v34 = vsub.f32 %v877_v14, %v880_v33 }
 0x416   : > { %v882_v35 = vmul.f32 1.442695, %v881_v34 }
 0x418   : > { %1375 = vpow2.f32 %v882_v35 }
 0x41a   : > { %v1374_v36 = vpop.eup %1373 }
 0x41b   : > { %v773_v38 = vsel %vm652_vm7, %v1374_v36, 0.0  ;;  %v991_v41 = vpop.xlane.xlu1 %990 }
 0x41c   : > { %774 = vadd.xlane.f32.xlu1 %v773_v38  ;;  %v992_v42 = vsub.f32 %v988_v20, %v991_v41 }
 0x41e   : > { %v993_v43 = vmul.f32 1.442695, %v992_v42 }
 0x420   : > { %1377 = vpow2.f32 %v993_v43 }
 0x422   : > { %v1376_v39 = vpop.eup %1375 }
 0x423   : > { %v884_v40 = vsel %vm652_vm7, %v1376_v39, 0.0 }
 0x424   : > { %885 = vadd.xlane.f32.xlu0 %v884_v40 }
 0x42a   : > { %v1378_v44 = vpop.eup %1377 }
 0x42b   : > { %v995_v45 = vsel %vm652_vm7, %v1378_v44, 0.0 }
 0x42d   : > { %779 = vrot.lane.b32.xlu1 %v1531_v37, %s1401_s14 }
 0x436   : > { %v661_v46 = vpop.xlane.xlu0 %660 }
 0x437   : > { %1379 = vrcp.f32 %v661_v46 }
 0x43a   : > { %666 = vrot.lane.b32.xlu0 %v1531_v37, %s1402_s15 }
 0x43e   : > { %1001 = vrot.lane.b32.xlu0 %v1531_v37, %s1403_s16 }
 0x441   : > { %v1380_v48 = vpop.eup %1379 }
 0x442   : > { %v663_v50 = vmul.f32 %v1380_v48, %v1372_v28 }
 0x444   : > { %v664_v54 = vpack.c.bf16 %v663_v50, %v663_v50 }
 0x451   : > { %996 = vadd.xlane.f32.xlu1 %v995_v45 }
 0x462   : > { %890 = vrot.lane.b32.xlu1 %v1531_v37, %s1404_s20 }
 0x4a9   : > { %v775_v47 = vpop.xlane.xlu1 %774 }
 0x4aa   : > { %1381 = vrcp.f32 %v775_v47 }
 0x4ad   : > { %v780_v53 = vpop.permute.xlu1 %779 }
 0x4ae   : > { %v785_v56 = vsel %vm671_vm8, %v780_v53, 0 }
 0x4b1   : > { %v886_v49 = vpop.xlane.xlu0 %885 }
 0x4b2   : > { %1383 = vrcp.f32 %v886_v49 }
 0x4b4   : > { %v1382_v55 = vpop.eup %1381 }
 0x4b5   : > { %v667_v51 = vpop.permute.xlu0 %666  ;;  %v777_v37 = vmul.f32 %v1382_v55, %v1374_v36 }
 0x4b6   : > { %v673_v52 = vsel %vm671_vm8, %v667_v51, 0 }
 0x4b7   : > { %1291 = vmatpush3.bf16.msra.mxu1 %v673_v52  ;;  %v778_v57 = vpack.c.bf16 %v777_v37, %v777_v37 }
 0x4b8   : > { %1302 = vmatprep.subr.bf16.mxu1 %v1395_v8 }
 0x4b9   : > { %v1002_v63 = vpop.permute.xlu0 %1001 }
 0x4ba   : > { %1293 = vmatmul.mubr.msk.bf16.vlgmr.msra.gmra.mrb[4].mxu1 %vm652_vm7, %v664_v54  ;;  %v1007_v2 = vsel %vm671_vm8, %v1002_v63, 0 }
 0x4bb   : > { %1303 = vmatpush3.bf16.msra.mxu1 %v785_v56  ;;  %1304 = vmatprep.mubr.msk.bf16.mxu1 %vm1396_vm1, %v1395_v8 }
 0x4bc   : > { %1314 = vmatprep.subr.bf16.mxu1 %v1395_v8  ;;  %v1384_v58 = vpop.eup %1383 }
 0x4bd   : > { %v888_v60 = vmul.f32 %v1384_v58, %v1376_v39 }
 0x4bf   : > { %v889_v1 = vpack.c.bf16 %v888_v60, %v888_v60 }
 0x4c2   : > { %1305 = vmatmul.mubr.msk.bf16.vlgmr.msra.gmra.mrb[8].mxu1 %vm652_vm7, %v778_v57 }
 0x4c3   : > { %1316 = vmatprep.mubr.msk.bf16.mxu1 %vm1396_vm1, %v1395_v8 }
 0x4de   : > { %v997_v59 = vpop.xlane.xlu1 %996 }
 0x4df   : > { %1385 = vrcp.f32 %v997_v59 }
 0x4e2   : > { %v891_v61 = vpop.permute.xlu1 %890 }
 0x4e3   : > { %v896_v62 = vsel %vm671_vm8, %v891_v61, 0 }
 0x4e4   : > { %1315 = vmatpush3.bf16.msra.mxu1 %v896_v62 }
 0x4e5   : > { %1326 = vmatprep.subr.bf16.mxu1 %v1395_v8 }
 0x4e7   : > { %1317 = vmatmul.mubr.msk.bf16.vlgmr.msra.gmra.mrb[12].mxu1 %vm652_vm7, %v889_v1 }
 0x4e8   : > { %1327 = vmatpush3.bf16.msra.mxu1 %v1007_v2  ;;  %1328 = vmatprep.mubr.msk.bf16.mxu1 %vm1396_vm1, %v1395_v8 }
 0x4e9   : > { %v1386_v3 = vpop.eup %1385 }
 0x4ea   : > { %v999_v4 = vmul.f32 %v1386_v3, %v1378_v44 }
 0x4ec   : > { %v1000_v5 = vpack.c.bf16 %v999_v4, %v999_v4 }
 0x4ef   : > { %1329 = vmatmul.mubr.msk.bf16.vlgmr.msra.gmra.mrb[16].mxu1 %vm652_vm7, %v1000_v5 }
 0x58d   : > { %v709_v6 = vpop.f32.mrb[4].mxu1 }
 0x58e   : > { %v1294_v7 = vpop.f32.mrb[5].mxu1 }
 0x58f   : > { %v712_v9 = vpop.f32.mrb[6].mxu1 }
 0x590   : > { %v1295_v10 = vpop.f32.mrb[7].mxu1 }
 0x595   : > { %v821_v11 = vpop.f32.mrb[8].mxu1 }
 0x596   : > { %1050 = vrot.lane.b32.xlu1 %v821_v11, %s1405_s21  ;;  %v1306_v12 = vpop.f32.mrb[9].mxu1 }
 0x597   : > { %v824_v13 = vpop.f32.mrb[10].mxu1 }
 0x598   : > { %v1307_v14 = vpop.f32.mrb[11].mxu1 }
 0x5ba   : > { %v932_v17 = vpop.f32.mrb[12].mxu1 }
 0x5bb   : > { %1054 = vrot.lane.b32.xlu0 %v932_v17, %s1406_s26  ;;  %v1318_v18 = vpop.f32.mrb[13].mxu1 }
 0x5bc   : > { %v935_v19 = vpop.f32.mrb[14].mxu1 }
 0x5bd   : > { %v1319_v20 = vpop.f32.mrb[15].mxu1 }
 0x5c2   : > { %v1043_v21 = vpop.f32.mrb[16].mxu1 }
 0x5c3   : > { %1058 = vrot.lane.b32.xlu1 %v1043_v21, %s1407_s27  ;;  %v1330_v22 = vpop.f32.mrb[17].mxu1 }
 0x5c4   : > { %v1046_v23 = vpop.f32.mrb[18].mxu1 }
 0x5c5   : > { %v1331_v24 = vpop.f32.mrb[19].mxu1 }
 0x608   : > { %v1051_v25 = vpop.permute.xlu1 %1050 }
 0x609   : > { %v1061_v26 = vsel %vm597_vm4, %v709_v6, %v1051_v25 }
 0x62d   : > { %v1055_v8 = vpop.permute.xlu0 %1054 }
 0x62e   : > { %v1063_v27 = vsel %vm1062_vm9, %v1061_v26, %v1055_v8 }
 0x635   : > { %v1059_v28 = vpop.permute.xlu1 %1058 }
 0x636   : > { %v1065_v29 = vsel %vm1064_vm10, %v1063_v27, %v1059_v28 }
 0x637   : > { %v1066_v30 = vpack.c.bf16 %v1065_v29, %v1065_v29 }
 0x639   : > { %1337 = vmatmul.mubr.msk.bf16.vlgmr.msra.gmra.mrb[20].mxu0 %vm420_vm0, %v1066_v30 }
 0x70c   : > { %v1127_v32 = vpop.f32.mrb[20].mxu0 }
 0x70d   : > { %v1128_v33 = vadd.f32 %v1236_v31, %v1127_v32  ;;  %v1338_v34 = vpop.f32.mrb[21].mxu0 }
 0x70e   : > { %v1130_v35 = vpop.f32.mrb[22].mxu0 }
 0x70f   : > { %v1133_v36 = vadd.f32 %v1128_v33, %v1484_v0  ;;  %v1339_v38 = vpop.f32.mrb[23].mxu0 }
 0x711   : > { %1134 = vst.msk [vmem:[%s415_s13] sm:$0xff] %vm420_vm0, %v1133_v36 }
 0x712 PF: > { %s21_s17 = sadd.s32 1, %s1393_s17  }
 0x713   : > { %p18_p4 = scmp.ge.s32.totalorder %s21_s17, 4  }
 0x715   :  { %20 = sbr.rel (!%p18_p4) target bundleno = 1 (0x1), region = 100 }

</bundles_post_ra>
